<compile_context>
chip_gen: v6e
topology: v6e:2x2x1
jax: 0.10.0
libtpu: 0.0.40
codegen_flags: <defaults>
</compile_context>

<pallas_src>
import functools
import math

import jax
import jax.numpy as jnp
from jax.experimental import pallas as pl
from jax.experimental.pallas import tpu as pltpu

LN_EPS = 1e-5  # PyTorch nn.LayerNorm default
_MIB = 1024 * 1024
_DEFAULT_SCOPED_VMEM = 32 * _MIB


def _round_up(x, m):
    return ((x + m - 1) // m) * m


def _vmem_capacity_bytes():
    try:
        info = pltpu.get_tpu_info()
        cap = getattr(info, "vmem_capacity_bytes", None)
        if cap:
            return int(cap)
    except Exception:
        pass
    return 64 * _MIB  # conservative fallback (v7x per-TensorCore VMEM)


def _compiler_params(semantics, vmem_estimate_bytes):
    cap = int(0.9 * _vmem_capacity_bytes())
    vmem_limit = min(max(int(vmem_estimate_bytes * 1.3), _DEFAULT_SCOPED_VMEM), cap)
    return pltpu.CompilerParams(dimension_semantics=semantics,
                                vmem_limit_bytes=vmem_limit)


# ---------------------------------------------------------------------------
# in-kernel helpers (traced inside Pallas kernels; all math kept in f32)
# ---------------------------------------------------------------------------
def _layernorm(x, g, b):
    xf = x.astype(jnp.float32)
    mean = jnp.mean(xf, axis=-1, keepdims=True)
    var = jnp.mean(jnp.square(xf - mean), axis=-1, keepdims=True)
    return (xf - mean) * jax.lax.rsqrt(var + LN_EPS) * g + b


def _gelu(x):
    # TODO(synk): nn.GELU default is the exact erf formulation; using the tanh
    # approximation because erf has no guaranteed Mosaic lowering.
    c = math.sqrt(2.0 / math.pi)
    return 0.5 * x * (1.0 + jnp.tanh(c * (x + 0.044715 * x * x * x)))


# ---------------------------------------------------------------------------
# tiled patch-embedding matmul
# ---------------------------------------------------------------------------
def _matmul_kernel(a_ref, b_ref, o_ref, acc_ref):
    @pl.when(pl.program_id(2) == 0)
    def _():
        acc_ref[...] = jnp.zeros_like(acc_ref)

    acc_ref[...] += jnp.dot(a_ref[...], b_ref[...],
                            preferred_element_type=jnp.float32)

    @pl.when(pl.program_id(2) == pl.num_programs(2) - 1)
    def _():
        o_ref[...] = acc_ref[...].astype(o_ref.dtype)


def pallas_matmul(a, b, *, out_dtype=jnp.float32, tm=256, tn=256, tk_max=512):
    """Matmul; operands zero-padded to alignment, cast to bf16, tiled over
    (M, N, K) with an f32 VMEM accumulator.  K tile is a 128-multiple divisor of
    the 128-rounded K (no wasted zero-padding FLOPs)."""
    M, K = a.shape
    K2, N = b.shape
    assert K == K2
    Mp = _round_up(M, 16)                 # bf16 packs 16 sublanes per vreg
    tm = min(tm, Mp)
    Mp = _round_up(Mp, tm)
    Np = _round_up(N, 128)
    tn = min(tn, Np)
    Np = _round_up(Np, tn)
    Kp = _round_up(K, 128)
    if Kp <= tk_max:
        tk = Kp
    else:
        tk = 128
        for cand in range(tk_max, 127, -128):
            if Kp % cand == 0:
                tk = cand
                break

    a_p = jnp.pad(a, ((0, Mp - M), (0, Kp - K))).astype(jnp.bfloat16)
    b_p = jnp.pad(b, ((0, Kp - K), (0, Np - N))).astype(jnp.bfloat16)

    out_bytes = jnp.dtype(out_dtype).itemsize
    cost = pl.CostEstimate(
        flops=int(2 * Mp * Np * Kp), transcendentals=0,
        bytes_accessed=int(2 * (Mp * Kp + Kp * Np) + out_bytes * Mp * Np))
    vmem_est = 2 * 2 * (tm * tk + tk * tn) + (4 + 2 * out_bytes) * tm * tn

    out = pl.pallas_call(
        _matmul_kernel,
        grid=(Mp // tm, Np // tn, Kp // tk),
        in_specs=[pl.BlockSpec((tm, tk), lambda i, j, k: (i, k)),
                  pl.BlockSpec((tk, tn), lambda i, j, k: (k, j))],
        out_specs=pl.BlockSpec((tm, tn), lambda i, j, k: (i, j)),
        out_shape=jax.ShapeDtypeStruct((Mp, Np), out_dtype),
        scratch_shapes=[pltpu.VMEM((tm, tn), jnp.float32)],
        compiler_params=_compiler_params(("parallel", "parallel", "arbitrary"),
                                         vmem_est),
        cost_estimate=cost,
    )(a_p, b_p)
    return out[:M, :N]


# ---------------------------------------------------------------------------
# fused transformer kernel: grid = (batch_blocks, layer)
# ---------------------------------------------------------------------------
def _transformer_kernel(x_ref, pos_ref, lnpre_g_ref, lnpre_b_ref,
                        ln1g_ref, ln1b_ref, wqkv_ref, bqkv_ref, wo_ref, bo_ref,
                        ln2g_ref, ln2b_ref, wfc_ref, bfc_ref, wpr_ref, bpr_ref,
                        lnpost_g_ref, lnpost_b_ref, proj_ref,
                        out_ref, act_ref, ctx_ref, *, heads, seq_valid, bblk):
    l = pl.program_id(1)
    bf = jnp.bfloat16

    # layer 0: (x + positional_embedding) -> ln_pre seeds the carried activation
    @pl.when(l == 0)
    def _():
        x0 = x_ref[...].astype(jnp.float32) + pos_ref[0]          # (Bblk, S, D)
        x0 = x0.reshape(x0.shape[0] * x0.shape[1], x0.shape[2])   # (Bblk*S, D)
        act_ref[...] = _layernorm(x0, lnpre_g_ref[...], lnpre_b_ref[...])

    x = act_ref[...]                        # (M, D) f32, M = Bblk*S
    M, D = x.shape
    S = M // bblk
    hd = D // heads

    # ---- attention branch: x + attn(ln_1(x)) ----
    h = _layernorm(x, ln1g_ref[0], ln1b_ref[0])
    qkv = jnp.dot(h.astype(bf), wqkv_ref[0],
                  preferred_element_type=jnp.float32) + bqkv_ref[0]
    # q-scale (1/sqrt(hd)) is folded into w_qkv / b_qkv at weight-prep time.
    q_bf = qkv[:, 0:D].astype(bf)
    k_bf = qkv[:, D:2 * D].astype(bf)
    v_bf = qkv[:, 2 * D:3 * D].astype(bf)

    key_mask = None
    if seq_valid < S:  # mask padded key positions (static check)
        key_mask = jax.lax.broadcasted_iota(jnp.int32, (S, S), 1) < seq_valid

    # TODO(synk): per-(image, head) attention uses a static loop of 2-D matmuls;
    # a fully head-batched einsum needs an in-kernel (M,H,hd)->(H,M,hd) relayout
    # whose Mosaic lowering is not guaranteed.  Context vectors are written into
    # a (M, D) bf16 scratch so the output projection is ONE K=D matmul.
    for b in range(bblk):
        rows = slice(b * S, (b + 1) * S)
        for hh in range(heads):
            sl = slice(hh * hd, (hh + 1) * hd)
            s = jax.lax.dot_general(q_bf[rows, sl], k_bf[rows, sl],
                                    (((1,), (1,)), ((), ())),
                                    preferred_element_type=jnp.float32)   # (S, S)
            if key_mask is not None:
                s = jnp.where(key_mask, s, -1e30)
            s = s - jnp.max(s, axis=-1, keepdims=True)
            p = jnp.exp(s)
            p = p * pl.reciprocal(jnp.sum(p, axis=-1, keepdims=True), approx=True)
            ctx = jnp.dot(p.astype(bf), v_bf[rows, sl],
                          preferred_element_type=jnp.float32)             # (S, hd)
            ctx_ref[rows, sl] = ctx.astype(bf)

    attn = jnp.dot(ctx_ref[...], wo_ref[0],
                   preferred_element_type=jnp.float32) + bo_ref[0]        # (M, D)
    x1 = x + attn

    # ---- mlp branch: x + mlp(ln_2(x)) ----
    h2 = _layernorm(x1, ln2g_ref[0], ln2b_ref[0])
    f = jnp.dot(h2.astype(bf), wfc_ref[0],
                preferred_element_type=jnp.float32) + bfc_ref[0]
    f = _gelu(f)
    m = jnp.dot(f.astype(bf), wpr_ref[0],
                preferred_element_type=jnp.float32) + bpr_ref[0]
    x_out = x1 + m
    act_ref[...] = x_out

    # last layer: ln_post on the CLS token of each image + output projection
    @pl.when(l == pl.num_programs(1) - 1)
    def _():
        cls = jnp.concatenate([x_out[b * S:b * S + 1, :] for b in range(bblk)],
                              axis=0)                                     # (Bblk, D)
        hp = _layernorm(cls, lnpost_g_ref[...], lnpost_b_ref[...])
        res = jnp.dot(hp.astype(bf), proj_ref[...],
                      preferred_element_type=jnp.float32)                 # (Bblk, out)
        for b in range(bblk):
            out_ref[b] = res[b:b + 1, :]


def _pick_batch_block(B, S, D, Dh, out_dim):
    """Largest batch block that (a) divides B, (b) keeps >= 2 parallel grid steps
    when B >= 2 (v7x megacore), (c) fits a conservative VMEM budget, (d) <= 8."""
    budget = int(0.45 * _vmem_capacity_bytes())
    per_layer_w = (4 * D * D + 2 * D * Dh) * 2
    per_layer_b = (8 * D + Dh) * 4
    fixed = 2 * (per_layer_w + per_layer_b) + S * D * 4 + D * out_dim * 2
    best = 1
    for bb in range(1, min(B, 8) + 1):
        if B % bb:
            continue
        if B >= 2 and B // bb < 2:
            continue
        act = bb * S * (D * (2 * 2 + 4 + 2) + (3 * D + Dh + 2 * D) * 4) + 2 * S * S * 4
        if fixed + act <= budget:
            best = bb
    return best


def pallas_transformer(tokens, pos, params, *, heads, seq_valid, bblk):
    B, S, D = tokens.shape
    assert B % bblk == 0
    lp = params["layers"]
    L = lp["w_qkv"].shape[0]
    Dh = lp["w_fc"].shape[2]
    out_dim = params["proj"].shape[1]

    def batch_spec(shape):
        return pl.BlockSpec(shape, lambda b, l: (b,) + (0,) * (len(shape) - 1))

    def const_spec(shape):
        return pl.BlockSpec(shape, lambda b, l: (0,) * len(shape))

    def layer_spec(shape):
        return pl.BlockSpec((1,) + shape, lambda b, l: (l,) + (0,) * len(shape))

    in_specs = [
        batch_spec((bblk, S, D)),                           # tokens (per batch block)
        const_spec((1, S, D)),                              # positional embedding
        const_spec((1, D)), const_spec((1, D)),             # ln_pre gamma / beta
        layer_spec((1, D)), layer_spec((1, D)),             # ln_1 gamma / beta
        layer_spec((D, 3 * D)), layer_spec((1, 3 * D)),     # in-proj W^T / bias
        layer_spec((D, D)), layer_spec((1, D)),             # out-proj W^T / bias
        layer_spec((1, D)), layer_spec((1, D)),             # ln_2 gamma / beta
        layer_spec((D, Dh)), layer_spec((1, Dh)),           # mlp c_fc W^T / bias
        layer_spec((Dh, D)), layer_spec((1, D)),            # mlp c_proj W^T / bias
        const_spec((1, D)), const_spec((1, D)),             # ln_post gamma / beta
        const_spec((D, out_dim)),                           # output projection
    ]

    M = bblk * S
    per_layer_w = (4 * D * D + 2 * D * Dh) * 2              # bf16 bytes per layer
    per_layer_b = (8 * D + Dh) * 4
    vmem_est = (2 * (per_layer_w + per_layer_b)             # double-buffered weights
                + 2 * bblk * S * D * 2                      # double-buffered tokens
                + M * D * 4 + M * D * 2                     # act carry + ctx scratch
                + M * (3 * D + Dh + 2 * D) * 4              # qkv / mlp intermediates
                + 2 * S * S * 4                             # score / prob tiles
                + S * D * 4 + D * out_dim * 2 + 2 * bblk * out_dim * 4)

    n_bblocks = B // bblk
    flops = 2 * B * L * S * (4 * D * D + 2 * D * Dh + 2 * S * D) + 2 * B * D * out_dim
    transcendentals = B * L * S * (Dh + heads * S)
    bytes_accessed = (B * S * D * 2 + B * out_dim * 4 + S * D * 4
                      + n_bblocks * L * (per_layer_w + per_layer_b)
                      + D * out_dim * 2 + 8 * D)
    cost = pl.CostEstimate(flops=int(flops), transcendentals=int(transcendentals),
                           bytes_accessed=int(bytes_accessed))

    out = pl.pallas_call(
        functools.partial(_transformer_kernel, heads=heads, seq_valid=seq_valid,
                          bblk=bblk),
        grid=(n_bblocks, L),
        in_specs=in_specs,
        out_specs=pl.BlockSpec((bblk, 1, out_dim), lambda b, l: (b, 0, 0)),
        out_shape=jax.ShapeDtypeStruct((B, 1, out_dim), jnp.float32),
        scratch_shapes=[pltpu.VMEM((M, D), jnp.float32),    # activation carry
                        pltpu.VMEM((M, D), jnp.bfloat16)],  # per-head context slab
        compiler_params=_compiler_params(("parallel", "arbitrary"), vmem_est),
        cost_estimate=cost,
    )(
        tokens,
        pos.reshape(1, S, D),
        params["ln_pre_g"].reshape(1, D), params["ln_pre_b"].reshape(1, D),
        lp["ln1_g"], lp["ln1_b"],
        lp["w_qkv"], lp["b_qkv"],
        lp["w_o"], lp["b_o"],
        lp["ln2_g"], lp["ln2_b"],
        lp["w_fc"], lp["b_fc"],
        lp["w_pr"], lp["b_pr"],
        params["ln_post_g"].reshape(1, D), params["ln_post_b"].reshape(1, D),
        params["proj"],
    )
    return out[:, 0, :]


# ---------------------------------------------------------------------------
# full forward pass
# ---------------------------------------------------------------------------
def visual_transformer_forward(x, params, *, patch_size, heads):
    B, C, H, W = x.shape
    P = patch_size
    gh, gw = H // P, W // P
    width = params["conv_w"].shape[0]
    lp = params["layers"]
    Dh = lp["w_fc"].shape[2]
    out_dim = params["proj"].shape[1]

    # conv1 (kernel==stride, no bias) == patch embedding: im2col + tiled matmul
    patches = x.reshape(B, C, gh, P, gw, P).transpose(0, 2, 4, 1, 3, 5)
    patches = patches.reshape(B * gh * gw, C * P * P)
    w_patch = params["conv_w"].reshape(width, C * P * P).T                # (C*P*P, width)
    feat = pallas_matmul(patches, w_patch, out_dtype=jnp.bfloat16)
    feat = feat.reshape(B, gh * gw, width)                                # (B, N, width)

    # prepend class token; pad sequence to a multiple of 16 (softmax masks the pad)
    cls = jnp.broadcast_to(
        params["class_embedding"].astype(jnp.bfloat16).reshape(1, 1, width),
        (B, 1, width))
    tokens = jnp.concatenate([cls, feat], axis=1)                         # (B, S, width)
    S = tokens.shape[1]
    S_pad = _round_up(S, 16)
    pos = params["positional_embedding"]
    if S_pad != S:
        tokens = jnp.pad(tokens, ((0, 0), (0, S_pad - S), (0, 0)))
        pos = jnp.pad(pos, ((0, S_pad - S), (0, 0)))

    bblk = _pick_batch_block(B, S_pad, width, Dh, out_dim)

    # fused: pos-add + ln_pre + all resblocks + ln_post(CLS) + projection
    return pallas_transformer(tokens, pos, params, heads=heads, seq_valid=S,
                              bblk=bblk)


# ---------------------------------------------------------------------------
# one-time weight prep: fold q-scale into w_qkv/b_qkv, cast matmul weights to bf16
# ---------------------------------------------------------------------------
def prepare_params(params, *, heads):
    bf = jnp.bfloat16
    width = params["proj"].shape[0]
    hd = width // heads
    scale = hd ** -0.5
    qscale = jnp.concatenate([jnp.full((width,), scale, jnp.float32),
                              jnp.ones((2 * width,), jnp.float32)])
    p = dict(params)
    lp = dict(params["layers"])
    lp["w_qkv"] = (lp["w_qkv"].astype(jnp.float32) * qscale[None, None, :]).astype(bf)
    lp["b_qkv"] = lp["b_qkv"].astype(jnp.float32) * qscale[None, None, :]
    lp["w_o"] = lp["w_o"].astype(bf)
    lp["w_fc"] = lp["w_fc"].astype(bf)
    lp["w_pr"] = lp["w_pr"].astype(bf)
    p["layers"] = lp
    p["proj"] = params["proj"].astype(bf)
    return p


# ---------------------------------------------------------------------------
# deterministic parameter initialization (matches module shapes, layer-stacked)
# ---------------------------------------------------------------------------
def init_params(key, *, image_size, patch_size, width, layers, heads, mlp_ratio,
                output_dim):
    del heads  # only needed at prepare/runtime
    grid = image_size // patch_size
    seq = grid * grid + 1
    hidden = int(width * mlp_ratio)
    scale = width ** -0.5

    k = jax.random.split(key, 8)
    params = {
        "conv_w": 0.02 * jax.random.normal(k[0], (width, 3, patch_size, patch_size),
                                           jnp.float32),
        "class_embedding": scale * jax.random.normal(k[1], (width,), jnp.float32),
        "positional_embedding": scale * jax.random.normal(k[2], (seq, width),
                                                          jnp.float32),
        "ln_pre_g": jnp.ones((width,), jnp.float32),
        "ln_pre_b": jnp.zeros((width,), jnp.float32),
        "ln_post_g": jnp.ones((width,), jnp.float32),
        "ln_post_b": jnp.zeros((width,), jnp.float32),
        "proj": scale * jax.random.normal(k[3], (width, output_dim), jnp.float32),
        "layers": {
            "ln1_g": jnp.ones((layers, 1, width), jnp.float32),
            "ln1_b": jnp.zeros((layers, 1, width), jnp.float32),
            "w_qkv": 0.02 * jax.random.normal(k[4], (layers, width, 3 * width),
                                              jnp.float32),
            "b_qkv": jnp.zeros((layers, 1, 3 * width), jnp.float32),
            "w_o": 0.02 * jax.random.normal(k[5], (layers, width, width), jnp.float32),
            "b_o": jnp.zeros((layers, 1, width), jnp.float32),
            "ln2_g": jnp.ones((layers, 1, width), jnp.float32),
            "ln2_b": jnp.zeros((layers, 1, width), jnp.float32),
            "w_fc": 0.02 * jax.random.normal(k[6], (layers, width, hidden), jnp.float32),
            "b_fc": jnp.zeros((layers, 1, hidden), jnp.float32),
            "w_pr": 0.02 * jax.random.normal(k[7], (layers, hidden, width), jnp.float32),
            "b_pr": jnp.zeros((layers, 1, width), jnp.float32),
        },
    }
    return params


if __name__ == "__main__":
    image_size, patch_size = 16, 8
    width, layers, heads = 32, 2, 4
    mlp_ratio, output_dim = 4.0, 16
    batch = 2

    key = jax.random.PRNGKey(0)
    pkey, xkey = jax.random.split(key)
    params = init_params(pkey, image_size=image_size, patch_size=patch_size,
                         width=width, layers=layers, heads=heads,
                         mlp_ratio=mlp_ratio, output_dim=output_dim)
    params = prepare_params(params, heads=heads)   # one-time bf16 cast + q-scale fold
    x = jax.random.normal(xkey, (batch, 3, image_size, image_size), jnp.float32)

    fwd = jax.jit(functools.partial(visual_transformer_forward,
                                    patch_size=patch_size, heads=heads))
    out = fwd(x, params)
    out = jax.block_until_ready(out)
    assert out.shape == (batch, output_dim), out.shape
    assert jnp.all(jnp.isfinite(out))
    print("KERNEL_OK")
</pallas_src>

<mosaic_0001>
module attributes {stable_mosaic.version = 11 : i64} {
  func.func @_matmul_kernel(%arg0: i32, %arg1: i32, %arg2: i32, %arg3: memref<16x256xbf16, #tpu.memory_space<vmem>>, %arg4: memref<256x128xbf16, #tpu.memory_space<vmem>>, %arg5: memref<16x128xbf16, #tpu.memory_space<vmem>>, %arg6: memref<16x128xf32, #tpu.memory_space<vmem>>) attributes {dimension_semantics = [#tpu.dimension_semantics<parallel>, #tpu.dimension_semantics<parallel>, #tpu.dimension_semantics<arbitrary>], iteration_bounds = array<i64: 1, 1, 1>, scalar_prefetch = 0 : i64, scratch_operands = 1 : i64, tpu.core_type = #tpu.core_type<tc>, window_params = [{transform_indices = @transform_0, window_bounds = array<i64: 16, 256>}, {transform_indices = @transform_1, window_bounds = array<i64: 256, 128>}, {transform_indices = @transform_2, window_bounds = array<i64: 16, 128>}]} {
    %c0_i32 = arith.constant 0 : i32
    %0 = arith.cmpi eq, %arg2, %c0_i32 : i32
    %1 = arith.extui %0 : i1 to i32
    %c0_i32_0 = arith.constant 0 : i32
    %2 = arith.cmpi ne, %1, %c0_i32_0 : i32
    scf.if %2 {
      %cst_10 = arith.constant 0.000000e+00 : f32
      %12 = vector.broadcast %cst_10 : f32 to vector<16x128xf32>
      %c0_11 = arith.constant 0 : index
      %c0_12 = arith.constant 0 : index
      %13 = vector.load %arg6[%c0_11, %c0_12] : memref<16x128xf32, #tpu.memory_space<vmem>>, vector<16x128xf32>
      tpu.vector_store %arg6[%c0_11, %c0_12], %12 {strides = array<i32>} : memref<16x128xf32, #tpu.memory_space<vmem>>, vector<16x128xf32>,
    } else {
    }
    %c0 = arith.constant 0 : index
    %c0_1 = arith.constant 0 : index
    %3 = vector.load %arg6[%c0, %c0_1] : memref<16x128xf32, #tpu.memory_space<vmem>>, vector<16x128xf32>
    %c0_2 = arith.constant 0 : index
    %c0_3 = arith.constant 0 : index
    %4 = vector.load %arg3[%c0_2, %c0_3] : memref<16x256xbf16, #tpu.memory_space<vmem>>, vector<16x256xbf16>
    %c0_4 = arith.constant 0 : index
    %c0_5 = arith.constant 0 : index
    %5 = vector.load %arg4[%c0_4, %c0_5] : memref<256x128xbf16, #tpu.memory_space<vmem>>, vector<256x128xbf16>
    %cst = arith.constant dense<0.000000e+00> : vector<16x128xf32>
    %6 = tpu.matmul %4, %5, %cst {dimension_numbers = #tpu.dot_dimension_numbers<[1], [0], [0], [1], [0, 0, 1, 1], [], []>} : vector<16x256xbf16>, vector<256x128xbf16>, vector<16x128xf32> -> vector<16x128xf32>
    %7 = arith.addf %3, %6 : vector<16x128xf32>
    %c0_6 = arith.constant 0 : index
    %c0_7 = arith.constant 0 : index
    %8 = vector.load %arg6[%c0_6, %c0_7] : memref<16x128xf32, #tpu.memory_space<vmem>>, vector<16x128xf32>
    tpu.vector_store %arg6[%c0_6, %c0_7], %7 {strides = array<i32>} : memref<16x128xf32, #tpu.memory_space<vmem>>, vector<16x128xf32>,
    %c0_i32_8 = arith.constant 0 : i32
    %9 = arith.cmpi eq, %arg2, %c0_i32_8 : i32
    %10 = arith.extui %9 : i1 to i32
    %c0_i32_9 = arith.constant 0 : i32
    %11 = arith.cmpi ne, %10, %c0_i32_9 : i32
    scf.if %11 {
      %c0_10 = arith.constant 0 : index
      %c0_11 = arith.constant 0 : index
      %12 = vector.load %arg6[%c0_10, %c0_11] : memref<16x128xf32, #tpu.memory_space<vmem>>, vector<16x128xf32>
      %13 = arith.truncf %12 : vector<16x128xf32> to vector<16x128xbf16>
      %c0_12 = arith.constant 0 : index
      %c0_13 = arith.constant 0 : index
      %14 = vector.load %arg5[%c0_12, %c0_13] : memref<16x128xbf16, #tpu.memory_space<vmem>>, vector<16x128xbf16>
      tpu.vector_store %arg5[%c0_12, %c0_13], %13 {strides = array<i32>} : memref<16x128xbf16, #tpu.memory_space<vmem>>, vector<16x128xbf16>,
    } else {
    }
    return
  }
  func.func @transform_0(%arg0: i32, %arg1: i32, %arg2: i32) -> (i32, i32) {
    %c0_i32 = arith.constant 0 : i32
    return %arg0, %arg2 : i32, i32
  }
  func.func @transform_1(%arg0: i32, %arg1: i32, %arg2: i32) -> (i32, i32) {
    %c0_i32 = arith.constant 0 : i32
    return %arg2, %arg1 : i32, i32
  }
  func.func @transform_2(%arg0: i32, %arg1: i32, %arg2: i32) -> (i32, i32) {
    %c0_i32 = arith.constant 0 : i32
    return %arg0, %arg1 : i32, i32
  }
}

module attributes {stable_mosaic.version = 11 : i64} {
  func.func @_transformer_kernel(%arg0: i32, %arg1: i32, %arg2: memref<1x16x32xbf16, #tpu.memory_space<vmem>>, %arg3: memref<1x16x32xf32, #tpu.memory_space<vmem>>, %arg4: memref<1x32xf32, #tpu.memory_space<vmem>>, %arg5: memref<1x32xf32, #tpu.memory_space<vmem>>, %arg6: memref<1x1x32xf32, #tpu.memory_space<vmem>>, %arg7: memref<1x1x32xf32, #tpu.memory_space<vmem>>, %arg8: memref<1x32x96xbf16, #tpu.memory_space<vmem>>, %arg9: memref<1x1x96xf32, #tpu.memory_space<vmem>>, %arg10: memref<1x32x32xbf16, #tpu.memory_space<vmem>>, %arg11: memref<1x1x32xf32, #tpu.memory_space<vmem>>, %arg12: memref<1x1x32xf32, #tpu.memory_space<vmem>>, %arg13: memref<1x1x32xf32, #tpu.memory_space<vmem>>, %arg14: memref<1x32x128xbf16, #tpu.memory_space<vmem>>, %arg15: memref<1x1x128xf32, #tpu.memory_space<vmem>>, %arg16: memref<1x128x32xbf16, #tpu.memory_space<vmem>>, %arg17: memref<1x1x32xf32, #tpu.memory_space<vmem>>, %arg18: memref<1x32xf32, #tpu.memory_space<vmem>>, %arg19: memref<1x32xf32, #tpu.memory_space<vmem>>, %arg20: memref<32x16xbf16, #tpu.memory_space<vmem>>, %arg21: memref<1x1x16xf32, #tpu.memory_space<vmem>>, %arg22: memref<16x32xf32, #tpu.memory_space<vmem>>, %arg23: memref<16x32xbf16, #tpu.memory_space<vmem>>) attributes {dimension_semantics = [#tpu.dimension_semantics<parallel>, #tpu.dimension_semantics<arbitrary>], iteration_bounds = array<i64: 2, 2>, scalar_prefetch = 0 : i64, scratch_operands = 2 : i64, tpu.core_type = #tpu.core_type<tc>, window_params = [{transform_indices = @transform_0, window_bounds = array<i64: 1, 16, 32>}, {pipeline_mode = #tpu.pipeline_mode<synchronous>, transform_indices = @transform_1, window_bounds = array<i64: 1, 16, 32>}, {pipeline_mode = #tpu.pipeline_mode<synchronous>, transform_indices = @transform_2, window_bounds = array<i64: 1, 32>}, {pipeline_mode = #tpu.pipeline_mode<synchronous>, transform_indices = @transform_3, window_bounds = array<i64: 1, 32>}, {transform_indices = @transform_4, window_bounds = array<i64: 1, 1, 32>}, {transform_indices = @transform_5, window_bounds = array<i64: 1, 1, 32>}, {transform_indices = @transform_6, window_bounds = array<i64: 1, 32, 96>}, {transform_indices = @transform_7, window_bounds = array<i64: 1, 1, 96>}, {transform_indices = @transform_8, window_bounds = array<i64: 1, 32, 32>}, {transform_indices = @transform_9, window_bounds = array<i64: 1, 1, 32>}, {transform_indices = @transform_10, window_bounds = array<i64: 1, 1, 32>}, {transform_indices = @transform_11, window_bounds = array<i64: 1, 1, 32>}, {transform_indices = @transform_12, window_bounds = array<i64: 1, 32, 128>}, {transform_indices = @transform_13, window_bounds = array<i64: 1, 1, 128>}, {transform_indices = @transform_14, window_bounds = array<i64: 1, 128, 32>}, {transform_indices = @transform_15, window_bounds = array<i64: 1, 1, 32>}, {pipeline_mode = #tpu.pipeline_mode<synchronous>, transform_indices = @transform_16, window_bounds = array<i64: 1, 32>}, {pipeline_mode = #tpu.pipeline_mode<synchronous>, transform_indices = @transform_17, window_bounds = array<i64: 1, 32>}, {pipeline_mode = #tpu.pipeline_mode<synchronous>, transform_indices = @transform_18, window_bounds = array<i64: 32, 16>}, {transform_indices = @transform_19, window_bounds = array<i64: 1, 1, 16>}]} {
    %c0_i32 = arith.constant 0 : i32
    %0 = arith.cmpi eq, %arg1, %c0_i32 : i32
    %1 = arith.extui %0 : i1 to i32
    %c0_i32_0 = arith.constant 0 : i32
    %2 = arith.cmpi ne, %1, %c0_i32_0 : i32
    scf.if %2 {
      %c0_85 = arith.constant 0 : index
      %c0_86 = arith.constant 0 : index
      %c0_87 = arith.constant 0 : index
      %196 = vector.load %arg2[%c0_85, %c0_86, %c0_87] : memref<1x16x32xbf16, #tpu.memory_space<vmem>>, vector<1x16x32xbf16>
      %197 = arith.extf %196 : vector<1x16x32xbf16> to vector<1x16x32xf32>
      %c0_88 = arith.constant 0 : index
      %c0_89 = arith.constant 0 : index
      %c0_90 = arith.constant 0 : index
      %198 = vector.load %arg3[%c0_88, %c0_89, %c0_90] : memref<1x16x32xf32, #tpu.memory_space<vmem>>, vector<1x16x32xf32>
      %199 = vector.shape_cast %198 : vector<1x16x32xf32> to vector<16x32xf32>
      %200 = vector.shape_cast %199 : vector<16x32xf32> to vector<1x16x32xf32>
      %201 = arith.addf %197, %200 : vector<1x16x32xf32>
      %202 = vector.shape_cast %201 : vector<1x16x32xf32> to vector<16x32xf32>
      %c0_91 = arith.constant 0 : index
      %c0_92 = arith.constant 0 : index
      %203 = vector.load %arg4[%c0_91, %c0_92] : memref<1x32xf32, #tpu.memory_space<vmem>>, vector<1x32xf32>
      %c0_93 = arith.constant 0 : index
      %c0_94 = arith.constant 0 : index
      %204 = vector.load %arg5[%c0_93, %c0_94] : memref<1x32xf32, #tpu.memory_space<vmem>>, vector<1x32xf32>
      %cst_95 = arith.constant dense<0.000000e+00> : vector<16xf32>
      %205 = vector.multi_reduction <add>, %202, %cst_95 [1] : vector<16x32xf32> to vector<16xf32>
      %206 = vector.shape_cast %205 : vector<16xf32> to vector<16x1xf32>
      %cst_96 = arith.constant 3.200000e+01 : f32
      %207 = vector.broadcast %cst_96 : f32 to vector<16x1xf32>
      %208 = arith.divf %206, %207 : vector<16x1xf32>
      %209 = vector.broadcast %208 : vector<16x1xf32> to vector<16x32xf32>
      %210 = arith.subf %202, %209 : vector<16x32xf32>
      %211 = arith.mulf %210, %210 : vector<16x32xf32>
      %cst_97 = arith.constant dense<0.000000e+00> : vector<16xf32>
      %212 = vector.multi_reduction <add>, %211, %cst_97 [1] : vector<16x32xf32> to vector<16xf32>
      %213 = vector.shape_cast %212 : vector<16xf32> to vector<16x1xf32>
      %cst_98 = arith.constant 3.200000e+01 : f32
      %214 = vector.broadcast %cst_98 : f32 to vector<16x1xf32>
      %215 = arith.divf %213, %214 : vector<16x1xf32>
      %216 = vector.broadcast %208 : vector<16x1xf32> to vector<16x32xf32>
      %217 = arith.subf %202, %216 : vector<16x32xf32>
      %cst_99 = arith.constant 9.99999974E-6 : f32
      %218 = vector.broadcast %cst_99 : f32 to vector<16x1xf32>
      %219 = arith.addf %215, %218 : vector<16x1xf32>
      %220 = math.rsqrt %219 : vector<16x1xf32>
      %221 = vector.broadcast %220 : vector<16x1xf32> to vector<16x32xf32>
      %222 = arith.mulf %217, %221 : vector<16x32xf32>
      %223 = vector.broadcast %203 : vector<1x32xf32> to vector<16x32xf32>
      %224 = arith.mulf %222, %223 : vector<16x32xf32>
      %225 = vector.broadcast %204 : vector<1x32xf32> to vector<16x32xf32>
      %226 = arith.addf %224, %225 : vector<16x32xf32>
      %c0_100 = arith.constant 0 : index
      %c0_101 = arith.constant 0 : index
      %227 = vector.load %arg22[%c0_100, %c0_101] : memref<16x32xf32, #tpu.memory_space<vmem>>, vector<16x32xf32>
      tpu.vector_store %arg22[%c0_100, %c0_101], %226 {strides = array<i32>} : memref<16x32xf32, #tpu.memory_space<vmem>>, vector<16x32xf32>,
    } else {
    }
    %c0 = arith.constant 0 : index
    %c0_1 = arith.constant 0 : index
    %3 = vector.load %arg22[%c0, %c0_1] : memref<16x32xf32, #tpu.memory_space<vmem>>, vector<16x32xf32>
    %c0_2 = arith.constant 0 : index
    %c0_3 = arith.constant 0 : index
    %c0_4 = arith.constant 0 : index
    %4 = vector.load %arg6[%c0_2, %c0_3, %c0_4] : memref<1x1x32xf32, #tpu.memory_space<vmem>>, vector<1x1x32xf32>
    %5 = vector.shape_cast %4 : vector<1x1x32xf32> to vector<1x32xf32>
    %c0_5 = arith.constant 0 : index
    %c0_6 = arith.constant 0 : index
    %c0_7 = arith.constant 0 : index
    %6 = vector.load %arg7[%c0_5, %c0_6, %c0_7] : memref<1x1x32xf32, #tpu.memory_space<vmem>>, vector<1x1x32xf32>
    %7 = vector.shape_cast %6 : vector<1x1x32xf32> to vector<1x32xf32>
    %cst = arith.constant dense<0.000000e+00> : vector<16xf32>
    %8 = vector.multi_reduction <add>, %3, %cst [1] : vector<16x32xf32> to vector<16xf32>
    %9 = vector.shape_cast %8 : vector<16xf32> to vector<16x1xf32>
    %cst_8 = arith.constant 3.200000e+01 : f32
    %10 = vector.broadcast %cst_8 : f32 to vector<16x1xf32>
    %11 = arith.divf %9, %10 : vector<16x1xf32>
    %12 = vector.broadcast %11 : vector<16x1xf32> to vector<16x32xf32>
    %13 = arith.subf %3, %12 : vector<16x32xf32>
    %14 = arith.mulf %13, %13 : vector<16x32xf32>
    %cst_9 = arith.constant dense<0.000000e+00> : vector<16xf32>
    %15 = vector.multi_reduction <add>, %14, %cst_9 [1] : vector<16x32xf32> to vector<16xf32>
    %16 = vector.shape_cast %15 : vector<16xf32> to vector<16x1xf32>
    %cst_10 = arith.constant 3.200000e+01 : f32
    %17 = vector.broadcast %cst_10 : f32 to vector<16x1xf32>
    %18 = arith.divf %16, %17 : vector<16x1xf32>
    %19 = vector.broadcast %11 : vector<16x1xf32> to vector<16x32xf32>
    %20 = arith.subf %3, %19 : vector<16x32xf32>
    %cst_11 = arith.constant 9.99999974E-6 : f32
    %21 = vector.broadcast %cst_11 : f32 to vector<16x1xf32>
    %22 = arith.addf %18, %21 : vector<16x1xf32>
    %23 = math.rsqrt %22 : vector<16x1xf32>
    %24 = vector.broadcast %23 : vector<16x1xf32> to vector<16x32xf32>
    %25 = arith.mulf %20, %24 : vector<16x32xf32>
    %26 = vector.broadcast %5 : vector<1x32xf32> to vector<16x32xf32>
    %27 = arith.mulf %25, %26 : vector<16x32xf32>
    %28 = vector.broadcast %7 : vector<1x32xf32> to vector<16x32xf32>
    %29 = arith.addf %27, %28 : vector<16x32xf32>
    %30 = arith.truncf %29 : vector<16x32xf32> to vector<16x32xbf16>
    %c0_12 = arith.constant 0 : index
    %c0_13 = arith.constant 0 : index
    %c0_14 = arith.constant 0 : index
    %31 = vector.load %arg8[%c0_12, %c0_13, %c0_14] : memref<1x32x96xbf16, #tpu.memory_space<vmem>>, vector<1x32x96xbf16>
    %32 = vector.shape_cast %31 : vector<1x32x96xbf16> to vector<32x96xbf16>
    %cst_15 = arith.constant dense<0.000000e+00> : vector<16x96xf32>
    %33 = tpu.matmul %30, %32, %cst_15 {dimension_numbers = #tpu.dot_dimension_numbers<[1], [0], [0], [1], [0, 0, 1, 1], [], []>} : vector<16x32xbf16>, vector<32x96xbf16>, vector<16x96xf32> -> vector<16x96xf32>
    %c0_16 = arith.constant 0 : index
    %c0_17 = arith.constant 0 : index
    %c0_18 = arith.constant 0 : index
    %34 = vector.load %arg9[%c0_16, %c0_17, %c0_18] : memref<1x1x96xf32, #tpu.memory_space<vmem>>, vector<1x1x96xf32>
    %35 = vector.shape_cast %34 : vector<1x1x96xf32> to vector<1x96xf32>
    %36 = vector.broadcast %35 : vector<1x96xf32> to vector<16x96xf32>
    %37 = arith.addf %33, %36 : vector<16x96xf32>
    %38 = vector.extract_strided_slice %37 {offsets = [0, 0], sizes = [16, 32], strides = [1, 1]} : vector<16x96xf32> to vector<16x32xf32>
    %39 = arith.truncf %38 : vector<16x32xf32> to vector<16x32xbf16>
    %40 = vector.extract_strided_slice %37 {offsets = [0, 32], sizes = [16, 32], strides = [1, 1]} : vector<16x96xf32> to vector<16x32xf32>
    %41 = arith.truncf %40 : vector<16x32xf32> to vector<16x32xbf16>
    %42 = vector.extract_strided_slice %37 {offsets = [0, 64], sizes = [16, 32], strides = [1, 1]} : vector<16x96xf32> to vector<16x32xf32>
    %43 = arith.truncf %42 : vector<16x32xf32> to vector<16x32xbf16>
    %44 = tpu.iota {dimensions = array<i32: 1>} : vector<16x16xi32>
    %c5_i32 = arith.constant 5 : i32
    %45 = vector.broadcast %c5_i32 : i32 to vector<16x16xi32>
    %46 = arith.cmpi slt, %44, %45 : vector<16x16xi32>
    %47 = vector.extract_strided_slice %39 {offsets = [0, 0], sizes = [16, 8], strides = [1, 1]} : vector<16x32xbf16> to vector<16x8xbf16>
    %48 = vector.extract_strided_slice %41 {offsets = [0, 0], sizes = [16, 8], strides = [1, 1]} : vector<16x32xbf16> to vector<16x8xbf16>
    %cst_19 = arith.constant dense<0.000000e+00> : vector<16x16xf32>
    %49 = tpu.matmul %47, %48, %cst_19 {dimension_numbers = #tpu.dot_dimension_numbers<[1], [1], [0], [0], [0, 0, 1, 0], [], []>} : vector<16x8xbf16>, vector<16x8xbf16>, vector<16x16xf32> -> vector<16x16xf32>
    %cst_20 = arith.constant -1.000000e+30 : f32
    %50 = vector.broadcast %cst_20 : f32 to vector<16x16xf32>
    %51 = arith.select %46, %49, %50 : vector<16x16xi1>, vector<16x16xf32>
    %cst_21 = arith.constant dense<0xFF800000> : vector<16xf32>
    %52 = vector.multi_reduction <maximumf>, %51, %cst_21 [1] : vector<16x16xf32> to vector<16xf32>
    %53 = vector.shape_cast %52 : vector<16xf32> to vector<16x1xf32>
    %54 = vector.broadcast %53 : vector<16x1xf32> to vector<16x16xf32>
    %55 = arith.subf %51, %54 : vector<16x16xf32>
    %56 = math.exp %55 : vector<16x16xf32>
    %cst_22 = arith.constant dense<0.000000e+00> : vector<16xf32>
    %57 = vector.multi_reduction <add>, %56, %cst_22 [1] : vector<16x16xf32> to vector<16xf32>
    %58 = vector.shape_cast %57 : vector<16xf32> to vector<16x1xf32>
    %59 = tpu.reciprocal %58 {approx = true} : vector<16x1xf32> -> vector<16x1xf32>
    %60 = vector.broadcast %59 : vector<16x1xf32> to vector<16x16xf32>
    %61 = arith.mulf %56, %60 : vector<16x16xf32>
    %62 = arith.truncf %61 : vector<16x16xf32> to vector<16x16xbf16>
    %63 = vector.extract_strided_slice %43 {offsets = [0, 0], sizes = [16, 8], strides = [1, 1]} : vector<16x32xbf16> to vector<16x8xbf16>
    %cst_23 = arith.constant dense<0.000000e+00> : vector<16x8xf32>
    %64 = tpu.matmul %62, %63, %cst_23 {dimension_numbers = #tpu.dot_dimension_numbers<[1], [0], [0], [1], [0, 0, 1, 1], [], []>} : vector<16x16xbf16>, vector<16x8xbf16>, vector<16x8xf32> -> vector<16x8xf32>
    %65 = arith.truncf %64 : vector<16x8xf32> to vector<16x8xbf16>
    %c0_24 = arith.constant 0 : index
    %c0_25 = arith.constant 0 : index
    %66 = vector.load %arg23[%c0_24, %c0_25] : memref<16x32xbf16, #tpu.memory_space<vmem>>, vector<16x8xbf16>
    tpu.vector_store %arg23[%c0_24, %c0_25], %65 {strides = array<i32>} : memref<16x32xbf16, #tpu.memory_space<vmem>>, vector<16x8xbf16>,
    %67 = vector.extract_strided_slice %39 {offsets = [0, 8], sizes = [16, 8], strides = [1, 1]} : vector<16x32xbf16> to vector<16x8xbf16>
    %68 = vector.extract_strided_slice %41 {offsets = [0, 8], sizes = [16, 8], strides = [1, 1]} : vector<16x32xbf16> to vector<16x8xbf16>
    %cst_26 = arith.constant dense<0.000000e+00> : vector<16x16xf32>
    %69 = tpu.matmul %67, %68, %cst_26 {dimension_numbers = #tpu.dot_dimension_numbers<[1], [1], [0], [0], [0, 0, 1, 0], [], []>} : vector<16x8xbf16>, vector<16x8xbf16>, vector<16x16xf32> -> vector<16x16xf32>
    %cst_27 = arith.constant -1.000000e+30 : f32
    %70 = vector.broadcast %cst_27 : f32 to vector<16x16xf32>
    %71 = arith.select %46, %69, %70 : vector<16x16xi1>, vector<16x16xf32>
    %cst_28 = arith.constant dense<0xFF800000> : vector<16xf32>
    %72 = vector.multi_reduction <maximumf>, %71, %cst_28 [1] : vector<16x16xf32> to vector<16xf32>
    %73 = vector.shape_cast %72 : vector<16xf32> to vector<16x1xf32>
    %74 = vector.broadcast %73 : vector<16x1xf32> to vector<16x16xf32>
    %75 = arith.subf %71, %74 : vector<16x16xf32>
    %76 = math.exp %75 : vector<16x16xf32>
    %cst_29 = arith.constant dense<0.000000e+00> : vector<16xf32>
    %77 = vector.multi_reduction <add>, %76, %cst_29 [1] : vector<16x16xf32> to vector<16xf32>
    %78 = vector.shape_cast %77 : vector<16xf32> to vector<16x1xf32>
    %79 = tpu.reciprocal %78 {approx = true} : vector<16x1xf32> -> vector<16x1xf32>
    %80 = vector.broadcast %79 : vector<16x1xf32> to vector<16x16xf32>
    %81 = arith.mulf %76, %80 : vector<16x16xf32>
    %82 = arith.truncf %81 : vector<16x16xf32> to vector<16x16xbf16>
    %83 = vector.extract_strided_slice %43 {offsets = [0, 8], sizes = [16, 8], strides = [1, 1]} : vector<16x32xbf16> to vector<16x8xbf16>
    %cst_30 = arith.constant dense<0.000000e+00> : vector<16x8xf32>
    %84 = tpu.matmul %82, %83, %cst_30 {dimension_numbers = #tpu.dot_dimension_numbers<[1], [0], [0], [1], [0, 0, 1, 1], [], []>} : vector<16x16xbf16>, vector<16x8xbf16>, vector<16x8xf32> -> vector<16x8xf32>
    %85 = arith.truncf %84 : vector<16x8xf32> to vector<16x8xbf16>
    %c0_31 = arith.constant 0 : index
    %c8 = arith.constant 8 : index
    %86 = vector.load %arg23[%c0_31, %c8] : memref<16x32xbf16, #tpu.memory_space<vmem>>, vector<16x8xbf16>
    tpu.vector_store %arg23[%c0_31, %c8], %85 {strides = array<i32>} : memref<16x32xbf16, #tpu.memory_space<vmem>>, vector<16x8xbf16>,
    %87 = vector.extract_strided_slice %39 {offsets = [0, 16], sizes = [16, 8], strides = [1, 1]} : vector<16x32xbf16> to vector<16x8xbf16>
    %88 = vector.extract_strided_slice %41 {offsets = [0, 16], sizes = [16, 8], strides = [1, 1]} : vector<16x32xbf16> to vector<16x8xbf16>
    %cst_32 = arith.constant dense<0.000000e+00> : vector<16x16xf32>
    %89 = tpu.matmul %87, %88, %cst_32 {dimension_numbers = #tpu.dot_dimension_numbers<[1], [1], [0], [0], [0, 0, 1, 0], [], []>} : vector<16x8xbf16>, vector<16x8xbf16>, vector<16x16xf32> -> vector<16x16xf32>
    %cst_33 = arith.constant -1.000000e+30 : f32
    %90 = vector.broadcast %cst_33 : f32 to vector<16x16xf32>
    %91 = arith.select %46, %89, %90 : vector<16x16xi1>, vector<16x16xf32>
    %cst_34 = arith.constant dense<0xFF800000> : vector<16xf32>
    %92 = vector.multi_reduction <maximumf>, %91, %cst_34 [1] : vector<16x16xf32> to vector<16xf32>
    %93 = vector.shape_cast %92 : vector<16xf32> to vector<16x1xf32>
    %94 = vector.broadcast %93 : vector<16x1xf32> to vector<16x16xf32>
    %95 = arith.subf %91, %94 : vector<16x16xf32>
    %96 = math.exp %95 : vector<16x16xf32>
    %cst_35 = arith.constant dense<0.000000e+00> : vector<16xf32>
    %97 = vector.multi_reduction <add>, %96, %cst_35 [1] : vector<16x16xf32> to vector<16xf32>
    %98 = vector.shape_cast %97 : vector<16xf32> to vector<16x1xf32>
    %99 = tpu.reciprocal %98 {approx = true} : vector<16x1xf32> -> vector<16x1xf32>
    %100 = vector.broadcast %99 : vector<16x1xf32> to vector<16x16xf32>
    %101 = arith.mulf %96, %100 : vector<16x16xf32>
    %102 = arith.truncf %101 : vector<16x16xf32> to vector<16x16xbf16>
    %103 = vector.extract_strided_slice %43 {offsets = [0, 16], sizes = [16, 8], strides = [1, 1]} : vector<16x32xbf16> to vector<16x8xbf16>
    %cst_36 = arith.constant dense<0.000000e+00> : vector<16x8xf32>
    %104 = tpu.matmul %102, %103, %cst_36 {dimension_numbers = #tpu.dot_dimension_numbers<[1], [0], [0], [1], [0, 0, 1, 1], [], []>} : vector<16x16xbf16>, vector<16x8xbf16>, vector<16x8xf32> -> vector<16x8xf32>
    %105 = arith.truncf %104 : vector<16x8xf32> to vector<16x8xbf16>
    %c0_37 = arith.constant 0 : index
    %c16 = arith.constant 16 : index
    %106 = vector.load %arg23[%c0_37, %c16] : memref<16x32xbf16, #tpu.memory_space<vmem>>, vector<16x8xbf16>
    tpu.vector_store %arg23[%c0_37, %c16], %105 {strides = array<i32>} : memref<16x32xbf16, #tpu.memory_space<vmem>>, vector<16x8xbf16>,
    %107 = vector.extract_strided_slice %39 {offsets = [0, 24], sizes = [16, 8], strides = [1, 1]} : vector<16x32xbf16> to vector<16x8xbf16>
    %108 = vector.extract_strided_slice %41 {offsets = [0, 24], sizes = [16, 8], strides = [1, 1]} : vector<16x32xbf16> to vector<16x8xbf16>
    %cst_38 = arith.constant dense<0.000000e+00> : vector<16x16xf32>
    %109 = tpu.matmul %107, %108, %cst_38 {dimension_numbers = #tpu.dot_dimension_numbers<[1], [1], [0], [0], [0, 0, 1, 0], [], []>} : vector<16x8xbf16>, vector<16x8xbf16>, vector<16x16xf32> -> vector<16x16xf32>
    %cst_39 = arith.constant -1.000000e+30 : f32
    %110 = vector.broadcast %cst_39 : f32 to vector<16x16xf32>
    %111 = arith.select %46, %109, %110 : vector<16x16xi1>, vector<16x16xf32>
    %cst_40 = arith.constant dense<0xFF800000> : vector<16xf32>
    %112 = vector.multi_reduction <maximumf>, %111, %cst_40 [1] : vector<16x16xf32> to vector<16xf32>
    %113 = vector.shape_cast %112 : vector<16xf32> to vector<16x1xf32>
    %114 = vector.broadcast %113 : vector<16x1xf32> to vector<16x16xf32>
    %115 = arith.subf %111, %114 : vector<16x16xf32>
    %116 = math.exp %115 : vector<16x16xf32>
    %cst_41 = arith.constant dense<0.000000e+00> : vector<16xf32>
    %117 = vector.multi_reduction <add>, %116, %cst_41 [1] : vector<16x16xf32> to vector<16xf32>
    %118 = vector.shape_cast %117 : vector<16xf32> to vector<16x1xf32>
    %119 = tpu.reciprocal %118 {approx = true} : vector<16x1xf32> -> vector<16x1xf32>
    %120 = vector.broadcast %119 : vector<16x1xf32> to vector<16x16xf32>
    %121 = arith.mulf %116, %120 : vector<16x16xf32>
    %122 = arith.truncf %121 : vector<16x16xf32> to vector<16x16xbf16>
    %123 = vector.extract_strided_slice %43 {offsets = [0, 24], sizes = [16, 8], strides = [1, 1]} : vector<16x32xbf16> to vector<16x8xbf16>
    %cst_42 = arith.constant dense<0.000000e+00> : vector<16x8xf32>
    %124 = tpu.matmul %122, %123, %cst_42 {dimension_numbers = #tpu.dot_dimension_numbers<[1], [0], [0], [1], [0, 0, 1, 1], [], []>} : vector<16x16xbf16>, vector<16x8xbf16>, vector<16x8xf32> -> vector<16x8xf32>
    %125 = arith.truncf %124 : vector<16x8xf32> to vector<16x8xbf16>
    %c0_43 = arith.constant 0 : index
    %c24 = arith.constant 24 : index
    %126 = vector.load %arg23[%c0_43, %c24] : memref<16x32xbf16, #tpu.memory_space<vmem>>, vector<16x8xbf16>
    tpu.vector_store %arg23[%c0_43, %c24], %125 {strides = array<i32>} : memref<16x32xbf16, #tpu.memory_space<vmem>>, vector<16x8xbf16>,
    %c0_44 = arith.constant 0 : index
    %c0_45 = arith.constant 0 : index
    %127 = vector.load %arg23[%c0_44, %c0_45] : memref<16x32xbf16, #tpu.memory_space<vmem>>, vector<16x32xbf16>
    %c0_46 = arith.constant 0 : index
    %c0_47 = arith.constant 0 : index
    %c0_48 = arith.constant 0 : index
    %128 = vector.load %arg10[%c0_46, %c0_47, %c0_48] : memref<1x32x32xbf16, #tpu.memory_space<vmem>>, vector<1x32x32xbf16>
    %129 = vector.shape_cast %128 : vector<1x32x32xbf16> to vector<32x32xbf16>
    %cst_49 = arith.constant dense<0.000000e+00> : vector<16x32xf32>
    %130 = tpu.matmul %127, %129, %cst_49 {dimension_numbers = #tpu.dot_dimension_numbers<[1], [0], [0], [1], [0, 0, 1, 1], [], []>} : vector<16x32xbf16>, vector<32x32xbf16>, vector<16x32xf32> -> vector<16x32xf32>
    %c0_50 = arith.constant 0 : index
    %c0_51 = arith.constant 0 : index
    %c0_52 = arith.constant 0 : index
    %131 = vector.load %arg11[%c0_50, %c0_51, %c0_52] : memref<1x1x32xf32, #tpu.memory_space<vmem>>, vector<1x1x32xf32>
    %132 = vector.shape_cast %131 : vector<1x1x32xf32> to vector<1x32xf32>
    %133 = vector.broadcast %132 : vector<1x32xf32> to vector<16x32xf32>
    %134 = arith.addf %130, %133 : vector<16x32xf32>
    %135 = arith.addf %3, %134 : vector<16x32xf32>
    %c0_53 = arith.constant 0 : index
    %c0_54 = arith.constant 0 : index
    %c0_55 = arith.constant 0 : index
    %136 = vector.load %arg12[%c0_53, %c0_54, %c0_55] : memref<1x1x32xf32, #tpu.memory_space<vmem>>, vector<1x1x32xf32>
    %137 = vector.shape_cast %136 : vector<1x1x32xf32> to vector<1x32xf32>
    %c0_56 = arith.constant 0 : index
    %c0_57 = arith.constant 0 : index
    %c0_58 = arith.constant 0 : index
    %138 = vector.load %arg13[%c0_56, %c0_57, %c0_58] : memref<1x1x32xf32, #tpu.memory_space<vmem>>, vector<1x1x32xf32>
    %139 = vector.shape_cast %138 : vector<1x1x32xf32> to vector<1x32xf32>
    %cst_59 = arith.constant dense<0.000000e+00> : vector<16xf32>
    %140 = vector.multi_reduction <add>, %135, %cst_59 [1] : vector<16x32xf32> to vector<16xf32>
    %141 = vector.shape_cast %140 : vector<16xf32> to vector<16x1xf32>
    %cst_60 = arith.constant 3.200000e+01 : f32
    %142 = vector.broadcast %cst_60 : f32 to vector<16x1xf32>
    %143 = arith.divf %141, %142 : vector<16x1xf32>
    %144 = vector.broadcast %143 : vector<16x1xf32> to vector<16x32xf32>
    %145 = arith.subf %135, %144 : vector<16x32xf32>
    %146 = arith.mulf %145, %145 : vector<16x32xf32>
    %cst_61 = arith.constant dense<0.000000e+00> : vector<16xf32>
    %147 = vector.multi_reduction <add>, %146, %cst_61 [1] : vector<16x32xf32> to vector<16xf32>
    %148 = vector.shape_cast %147 : vector<16xf32> to vector<16x1xf32>
    %cst_62 = arith.constant 3.200000e+01 : f32
    %149 = vector.broadcast %cst_62 : f32 to vector<16x1xf32>
    %150 = arith.divf %148, %149 : vector<16x1xf32>
    %151 = vector.broadcast %143 : vector<16x1xf32> to vector<16x32xf32>
    %152 = arith.subf %135, %151 : vector<16x32xf32>
    %cst_63 = arith.constant 9.99999974E-6 : f32
    %153 = vector.broadcast %cst_63 : f32 to vector<16x1xf32>
    %154 = arith.addf %150, %153 : vector<16x1xf32>
    %155 = math.rsqrt %154 : vector<16x1xf32>
    %156 = vector.broadcast %155 : vector<16x1xf32> to vector<16x32xf32>
    %157 = arith.mulf %152, %156 : vector<16x32xf32>
    %158 = vector.broadcast %137 : vector<1x32xf32> to vector<16x32xf32>
    %159 = arith.mulf %157, %158 : vector<16x32xf32>
    %160 = vector.broadcast %139 : vector<1x32xf32> to vector<16x32xf32>
    %161 = arith.addf %159, %160 : vector<16x32xf32>
    %162 = arith.truncf %161 : vector<16x32xf32> to vector<16x32xbf16>
    %c0_64 = arith.constant 0 : index
    %c0_65 = arith.constant 0 : index
    %c0_66 = arith.constant 0 : index
    %163 = vector.load %arg14[%c0_64, %c0_65, %c0_66] : memref<1x32x128xbf16, #tpu.memory_space<vmem>>, vector<1x32x128xbf16>
    %164 = vector.shape_cast %163 : vector<1x32x128xbf16> to vector<32x128xbf16>
    %cst_67 = arith.constant dense<0.000000e+00> : vector<16x128xf32>
    %165 = tpu.matmul %162, %164, %cst_67 {dimension_numbers = #tpu.dot_dimension_numbers<[1], [0], [0], [1], [0, 0, 1, 1], [], []>} : vector<16x32xbf16>, vector<32x128xbf16>, vector<16x128xf32> -> vector<16x128xf32>
    %c0_68 = arith.constant 0 : index
    %c0_69 = arith.constant 0 : index
    %c0_70 = arith.constant 0 : index
    %166 = vector.load %arg15[%c0_68, %c0_69, %c0_70] : memref<1x1x128xf32, #tpu.memory_space<vmem>>, vector<1x1x128xf32>
    %167 = vector.shape_cast %166 : vector<1x1x128xf32> to vector<1x128xf32>
    %168 = vector.broadcast %167 : vector<1x128xf32> to vector<16x128xf32>
    %169 = arith.addf %165, %168 : vector<16x128xf32>
    %cst_71 = arith.constant 5.000000e-01 : f32
    %170 = vector.broadcast %cst_71 : f32 to vector<16x128xf32>
    %171 = arith.mulf %170, %169 : vector<16x128xf32>
    %cst_72 = arith.constant 4.471500e-02 : f32
    %172 = vector.broadcast %cst_72 : f32 to vector<16x128xf32>
    %173 = arith.mulf %172, %169 : vector<16x128xf32>
    %174 = arith.mulf %173, %169 : vector<16x128xf32>
    %175 = arith.mulf %174, %169 : vector<16x128xf32>
    %176 = arith.addf %169, %175 : vector<16x128xf32>
    %cst_73 = arith.constant 0.797884583 : f32
    %177 = vector.broadcast %cst_73 : f32 to vector<16x128xf32>
    %178 = arith.mulf %177, %176 : vector<16x128xf32>
    %179 = math.tanh %178 : vector<16x128xf32>
    %cst_74 = arith.constant 1.000000e+00 : f32
    %180 = vector.broadcast %cst_74 : f32 to vector<16x128xf32>
    %181 = arith.addf %180, %179 : vector<16x128xf32>
    %182 = arith.mulf %171, %181 : vector<16x128xf32>
    %183 = arith.truncf %182 : vector<16x128xf32> to vector<16x128xbf16>
    %c0_75 = arith.constant 0 : index
    %c0_76 = arith.constant 0 : index
    %c0_77 = arith.constant 0 : index
    %184 = vector.load %arg16[%c0_75, %c0_76, %c0_77] : memref<1x128x32xbf16, #tpu.memory_space<vmem>>, vector<1x128x32xbf16>
    %185 = vector.shape_cast %184 : vector<1x128x32xbf16> to vector<128x32xbf16>
    %cst_78 = arith.constant dense<0.000000e+00> : vector<16x32xf32>
    %186 = tpu.matmul %183, %185, %cst_78 {dimension_numbers = #tpu.dot_dimension_numbers<[1], [0], [0], [1], [0, 0, 1, 1], [], []>} : vector<16x128xbf16>, vector<128x32xbf16>, vector<16x32xf32> -> vector<16x32xf32>
    %c0_79 = arith.constant 0 : index
    %c0_80 = arith.constant 0 : index
    %c0_81 = arith.constant 0 : index
    %187 = vector.load %arg17[%c0_79, %c0_80, %c0_81] : memref<1x1x32xf32, #tpu.memory_space<vmem>>, vector<1x1x32xf32>
    %188 = vector.shape_cast %187 : vector<1x1x32xf32> to vector<1x32xf32>
    %189 = vector.broadcast %188 : vector<1x32xf32> to vector<16x32xf32>
    %190 = arith.addf %186, %189 : vector<16x32xf32>
    %191 = arith.addf %135, %190 : vector<16x32xf32>
    %c0_82 = arith.constant 0 : index
    %c0_83 = arith.constant 0 : index
    %192 = vector.load %arg22[%c0_82, %c0_83] : memref<16x32xf32, #tpu.memory_space<vmem>>, vector<16x32xf32>
    tpu.vector_store %arg22[%c0_82, %c0_83], %191 {strides = array<i32>} : memref<16x32xf32, #tpu.memory_space<vmem>>, vector<16x32xf32>,
    %c1_i32 = arith.constant 1 : i32
    %193 = arith.cmpi eq, %arg1, %c1_i32 : i32
    %194 = arith.extui %193 : i1 to i32
    %c0_i32_84 = arith.constant 0 : i32
    %195 = arith.cmpi ne, %194, %c0_i32_84 : i32
    scf.if %195 {
      %196 = vector.extract_strided_slice %191 {offsets = [0, 0], sizes = [1, 32], strides = [1, 1]} : vector<16x32xf32> to vector<1x32xf32>
      %c0_85 = arith.constant 0 : index
      %c0_86 = arith.constant 0 : index
      %197 = vector.load %arg18[%c0_85, %c0_86] : memref<1x32xf32, #tpu.memory_space<vmem>>, vector<1x32xf32>
      %c0_87 = arith.constant 0 : index
      %c0_88 = arith.constant 0 : index
      %198 = vector.load %arg19[%c0_87, %c0_88] : memref<1x32xf32, #tpu.memory_space<vmem>>, vector<1x32xf32>
      %cst_89 = arith.constant dense<0.000000e+00> : vector<1xf32>
      %199 = vector.multi_reduction <add>, %196, %cst_89 [1] : vector<1x32xf32> to vector<1xf32>
      %200 = vector.shape_cast %199 : vector<1xf32> to vector<1x1xf32>
      %cst_90 = arith.constant 3.200000e+01 : f32
      %201 = vector.broadcast %cst_90 : f32 to vector<1x1xf32>
      %202 = arith.divf %200, %201 : vector<1x1xf32>
      %203 = vector.broadcast %202 : vector<1x1xf32> to vector<1x32xf32>
      %204 = arith.subf %196, %203 : vector<1x32xf32>
      %205 = arith.mulf %204, %204 : vector<1x32xf32>
      %cst_91 = arith.constant dense<0.000000e+00> : vector<1xf32>
      %206 = vector.multi_reduction <add>, %205, %cst_91 [1] : vector<1x32xf32> to vector<1xf32>
      %207 = vector.shape_cast %206 : vector<1xf32> to vector<1x1xf32>
      %cst_92 = arith.constant 3.200000e+01 : f32
      %208 = vector.broadcast %cst_92 : f32 to vector<1x1xf32>
      %209 = arith.divf %207, %208 : vector<1x1xf32>
      %210 = vector.broadcast %202 : vector<1x1xf32> to vector<1x32xf32>
      %211 = arith.subf %196, %210 : vector<1x32xf32>
      %cst_93 = arith.constant 9.99999974E-6 : f32
      %212 = vector.broadcast %cst_93 : f32 to vector<1x1xf32>
      %213 = arith.addf %209, %212 : vector<1x1xf32>
      %214 = math.rsqrt %213 : vector<1x1xf32>
      %215 = vector.broadcast %214 : vector<1x1xf32> to vector<1x32xf32>
      %216 = arith.mulf %211, %215 : vector<1x32xf32>
      %217 = arith.mulf %216, %197 : vector<1x32xf32>
      %218 = arith.addf %217, %198 : vector<1x32xf32>
      %219 = arith.truncf %218 : vector<1x32xf32> to vector<1x32xbf16>
      %c0_94 = arith.constant 0 : index
      %c0_95 = arith.constant 0 : index
      %220 = vector.load %arg20[%c0_94, %c0_95] : memref<32x16xbf16, #tpu.memory_space<vmem>>, vector<32x16xbf16>
      %cst_96 = arith.constant dense<0.000000e+00> : vector<1x16xf32>
      %221 = tpu.matmul %219, %220, %cst_96 {dimension_numbers = #tpu.dot_dimension_numbers<[1], [0], [0], [1], [0, 0, 1, 1], [], []>} : vector<1x32xbf16>, vector<32x16xbf16>, vector<1x16xf32> -> vector<1x16xf32>
      %c0_97 = arith.constant 0 : index
      %c0_98 = arith.constant 0 : index
      %c0_99 = arith.constant 0 : index
      %222 = vector.load %arg21[%c0_97, %c0_98, %c0_99] : memref<1x1x16xf32, #tpu.memory_space<vmem>>, vector<1x1x16xf32>
      %223 = vector.shape_cast %222 : vector<1x1x16xf32> to vector<1x16xf32>
      %224 = vector.shape_cast %221 : vector<1x16xf32> to vector<1x1x16xf32>
      tpu.vector_store %arg21[%c0_97, %c0_98, %c0_99], %224 {strides = array<i32>} : memref<1x1x16xf32, #tpu.memory_space<vmem>>, vector<1x1x16xf32>,
    } else {
    }
    return
  }
  func.func @transform_0(%arg0: i32, %arg1: i32) -> (i32, i32, i32) {
    %c0_i32 = arith.constant 0 : i32
    %c0_i32_0 = arith.constant 0 : i32
    %c0_i32_1 = arith.constant 0 : i32
    return %arg0, %c0_i32, %c0_i32_0 : i32, i32, i32
  }
  func.func @transform_1(%arg0: i32, %arg1: i32) -> (i32, i32, i32) {
    %c0_i32 = arith.constant 0 : i32
    %c0_i32_0 = arith.constant 0 : i32
    %c0_i32_1 = arith.constant 0 : i32
    %c0_i32_2 = arith.constant 0 : i32
    return %c0_i32, %c0_i32_0, %c0_i32_1 : i32, i32, i32
  }
  func.func @transform_2(%arg0: i32, %arg1: i32) -> (i32, i32) {
    %c0_i32 = arith.constant 0 : i32
    %c0_i32_0 = arith.constant 0 : i32
    %c0_i32_1 = arith.constant 0 : i32
    return %c0_i32, %c0_i32_0 : i32, i32
  }
  func.func @transform_3(%arg0: i32, %arg1: i32) -> (i32, i32) {
    %c0_i32 = arith.constant 0 : i32
    %c0_i32_0 = arith.constant 0 : i32
    %c0_i32_1 = arith.constant 0 : i32
    return %c0_i32, %c0_i32_0 : i32, i32
  }
  func.func @transform_4(%arg0: i32, %arg1: i32) -> (i32, i32, i32) {
    %c0_i32 = arith.constant 0 : i32
    %c0_i32_0 = arith.constant 0 : i32
    %c0_i32_1 = arith.constant 0 : i32
    return %arg1, %c0_i32, %c0_i32_0 : i32, i32, i32
  }
  func.func @transform_5(%arg0: i32, %arg1: i32) -> (i32, i32, i32) {
    %c0_i32 = arith.constant 0 : i32
    %c0_i32_0 = arith.constant 0 : i32
    %c0_i32_1 = arith.constant 0 : i32
    return %arg1, %c0_i32, %c0_i32_0 : i32, i32, i32
  }
  func.func @transform_6(%arg0: i32, %arg1: i32) -> (i32, i32, i32) {
    %c0_i32 = arith.constant 0 : i32
    %c0_i32_0 = arith.constant 0 : i32
    %c0_i32_1 = arith.constant 0 : i32
    return %arg1, %c0_i32, %c0_i32_0 : i32, i32, i32
  }
  func.func @transform_7(%arg0: i32, %arg1: i32) -> (i32, i32, i32) {
    %c0_i32 = arith.constant 0 : i32
    %c0_i32_0 = arith.constant 0 : i32
    %c0_i32_1 = arith.constant 0 : i32
    return %arg1, %c0_i32, %c0_i32_0 : i32, i32, i32
  }
  func.func @transform_8(%arg0: i32, %arg1: i32) -> (i32, i32, i32) {
    %c0_i32 = arith.constant 0 : i32
    %c0_i32_0 = arith.constant 0 : i32
    %c0_i32_1 = arith.constant 0 : i32
    return %arg1, %c0_i32, %c0_i32_0 : i32, i32, i32
  }
  func.func @transform_9(%arg0: i32, %arg1: i32) -> (i32, i32, i32) {
    %c0_i32 = arith.constant 0 : i32
    %c0_i32_0 = arith.constant 0 : i32
    %c0_i32_1 = arith.constant 0 : i32
    return %arg1, %c0_i32, %c0_i32_0 : i32, i32, i32
  }
  func.func @transform_10(%arg0: i32, %arg1: i32) -> (i32, i32, i32) {
    %c0_i32 = arith.constant 0 : i32
    %c0_i32_0 = arith.constant 0 : i32
    %c0_i32_1 = arith.constant 0 : i32
    return %arg1, %c0_i32, %c0_i32_0 : i32, i32, i32
  }
  func.func @transform_11(%arg0: i32, %arg1: i32) -> (i32, i32, i32) {
    %c0_i32 = arith.constant 0 : i32
    %c0_i32_0 = arith.constant 0 : i32
    %c0_i32_1 = arith.constant 0 : i32
    return %arg1, %c0_i32, %c0_i32_0 : i32, i32, i32
  }
  func.func @transform_12(%arg0: i32, %arg1: i32) -> (i32, i32, i32) {
    %c0_i32 = arith.constant 0 : i32
    %c0_i32_0 = arith.constant 0 : i32
    %c0_i32_1 = arith.constant 0 : i32
    return %arg1, %c0_i32, %c0_i32_0 : i32, i32, i32
  }
  func.func @transform_13(%arg0: i32, %arg1: i32) -> (i32, i32, i32) {
    %c0_i32 = arith.constant 0 : i32
    %c0_i32_0 = arith.constant 0 : i32
    %c0_i32_1 = arith.constant 0 : i32
    return %arg1, %c0_i32, %c0_i32_0 : i32, i32, i32
  }
  func.func @transform_14(%arg0: i32, %arg1: i32) -> (i32, i32, i32) {
    %c0_i32 = arith.constant 0 : i32
    %c0_i32_0 = arith.constant 0 : i32
    %c0_i32_1 = arith.constant 0 : i32
    return %arg1, %c0_i32, %c0_i32_0 : i32, i32, i32
  }
  func.func @transform_15(%arg0: i32, %arg1: i32) -> (i32, i32, i32) {
    %c0_i32 = arith.constant 0 : i32
    %c0_i32_0 = arith.constant 0 : i32
    %c0_i32_1 = arith.constant 0 : i32
    return %arg1, %c0_i32, %c0_i32_0 : i32, i32, i32
  }
  func.func @transform_16(%arg0: i32, %arg1: i32) -> (i32, i32) {
    %c0_i32 = arith.constant 0 : i32
    %c0_i32_0 = arith.constant 0 : i32
    %c0_i32_1 = arith.constant 0 : i32
    return %c0_i32, %c0_i32_0 : i32, i32
  }
  func.func @transform_17(%arg0: i32, %arg1: i32) -> (i32, i32) {
    %c0_i32 = arith.constant 0 : i32
    %c0_i32_0 = arith.constant 0 : i32
    %c0_i32_1 = arith.constant 0 : i32
    return %c0_i32, %c0_i32_0 : i32, i32
  }
  func.func @transform_18(%arg0: i32, %arg1: i32) -> (i32, i32) {
    %c0_i32 = arith.constant 0 : i32
    %c0_i32_0 = arith.constant 0 : i32
    %c0_i32_1 = arith.constant 0 : i32
    return %c0_i32, %c0_i32_0 : i32, i32
  }
  func.func @transform_19(%arg0: i32, %arg1: i32) -> (i32, i32, i32) {
    %c0_i32 = arith.constant 0 : i32
    %c0_i32_0 = arith.constant 0 : i32
    %c0_i32_1 = arith.constant 0 : i32
    return %arg0, %c0_i32, %c0_i32_0 : i32, i32, i32
  }
}

</mosaic_0001>

<bundles_post_ra>
// kernel: visual_transformer_forward.2
= control target key start
LH: loop header
LB: loop body
LE: loop exit
PB: predicated region body
PF: predicated region fallthrough
CT: control target
= control target key end

     0   :  { %s364_s1 = inlined_call_operand.vmem [shape: bf16[256,128], index: 1, kind: input, shape index: {}]   ;;  %s365_s0 = inlined_call_operand.vmem [shape: bf16[16,256], index: 0, kind: input, shape index: {}]   ;;  %s366_s2 = inlined_call_operand.vmem [shape: bf16[16,128], index: 2, kind: output, shape index: {}]  }
   0x1   :  { %v273_v0 = vld [vmem:[%s364_s1 + $0x78] sm:$0xff]   ;;  %v275_v2 = vld [vmem:[%s364_s1 + $0x70] sm:$0xff]   ;;  %v277_v4 = vld [vmem:[%s364_s1 + $0x68] sm:$0xff]  }
   0x2   :  { %v274_v1 = vld [vmem:[%s364_s1 + $0x38] sm:$0xff]   ;;  %251 = vmatprep.subr.bf16.mxu0 %v273_v0  ;;  %v276_v3 = vld [vmem:[%s364_s1 + $0x30] sm:$0xff]   ;;  %v278_v5 = vld [vmem:[%s364_s1 + $0x28] sm:$0xff]  }
   0x3   :  { %252 = vmatpush3.bf16.msra.mxu0 %v274_v1  ;;  %v279_v6 = vld [vmem:[%s364_s1 + $0x60] sm:$0xff]   ;;  %v281_v8 = vld [vmem:[%s364_s1 + $0x58] sm:$0xff]   ;;  %v283_v10 = vld [vmem:[%s364_s1 + $0x50] sm:$0xff]  }
   0x4   :  { %253 = vmatprep.subr.bf16.mxu0 %v275_v2  ;;  %v280_v7 = vld [vmem:[%s364_s1 + $0x20] sm:$0xff]   ;;  %v282_v9 = vld [vmem:[%s364_s1 + $0x18] sm:$0xff]   ;;  %v284_v12 = vld [vmem:[%s364_s1 + $0x10] sm:$0xff]  }
   0x5   :  { %v291_v11 = vld [vmem:[%s365_s0 + $0x4] ss:$8 sps:$4 sm:$0xff]   ;;  %v289_v17 = vld [vmem:[%s365_s0] ss:$8 sps:$4 sm:$0xff]  }
   0x6   :  { %192 = vmatprep.mubr.bf16.mxu0 %v291_v11  ;;  %v285_v13 = vld [vmem:[%s364_s1 + $0x48] sm:$0xff]   ;;  %v287_v15 = vld [vmem:[%s364_s1 + $0x40] sm:$0xff]  }
   0x7   :  { %254 = vmatpush3.bf16.msra.mxu0 %v276_v3  ;;  %v286_v14 = vld [vmem:[%s364_s1 + $0x8] sm:$0xff]   ;;  %v288_v16 = vld [vmem:[%s364_s1] sm:$0xff]  }
   0x8   :  { %255 = vmatprep.subr.bf16.mxu0 %v277_v4 }
   0xb   :  { %256 = vmatpush3.bf16.msra.mxu0 %v278_v5 }
   0xc   :  { %257 = vmatprep.subr.bf16.mxu0 %v279_v6 }
   0xf   :  { %258 = vmatpush3.bf16.msra.mxu0 %v280_v7 }
  0x10   :  { %259 = vmatprep.subr.bf16.mxu0 %v281_v8 }
  0x13   :  { %260 = vmatpush3.bf16.msra.mxu0 %v282_v9 }
  0x14   :  { %261 = vmatprep.subr.bf16.mxu0 %v283_v10 }
  0x17   :  { %262 = vmatpush3.bf16.msra.mxu0 %v284_v12 }
  0x18   :  { %263 = vmatprep.subr.bf16.mxu0 %v285_v13 }
  0x1b   :  { %264 = vmatpush3.bf16.msra.mxu0 %v286_v14 }
  0x1c   :  { %265 = vmatprep.subr.bf16.mxu0 %v287_v15 }
  0x1f   :  { %266 = vmatpush3.bf16.msra.mxu0 %v288_v16 }
  0x22   :  { %193 = vmatmul.mubr.bf16.vlgmr.msra.gmra.mxu0 %v289_v17 }
  0xe2   :  { %v267_v18 = vpop.f32.mrf.mxu0 }
  0xe4   :  { %v268_v19 = vpop.f32.mrf.mxu0 }
  0xe5   :  { %v269_v22 = vadd.f32 %v268_v19, %v267_v18 }
  0xe6   :  { %v270_v20 = vpop.f32.mrf.mxu0 }
  0xe8   :  { %v271_v21 = vpop.f32.mrf.mxu0 }
  0xe9   :  { %v272_v23 = vadd.f32 %v271_v21, %v270_v20 }
  0xeb   :  { %v249_v24 = vpack.c.bf16 %v272_v23, %v269_v22 }
  0xed   :  { %250 = vst [vmem:[%s366_s2] sm:$0xff] %v249_v24  }

// kernel: visual_transformer_forward.3
= control target key start
LH: loop header
LB: loop body
LE: loop exit
PB: predicated region body
PF: predicated region fallthrough
CT: control target
= control target key end

     0   :  { %s3135_s0 = inlined_call_operand.vmem [shape: bf16[2,16,32], index: 0, kind: input, shape index: {}]   ;;  %s3136_s1 = inlined_call_operand.vmem [shape: f32[1,16,32], index: 1, kind: input, shape index: {}]   ;;  %s3137_s2 = inlined_call_operand.vmem [shape: f32[1,32], index: 2, kind: input, shape index: {}]   ;;  %s3138_s3 = inlined_call_operand.vmem [shape: f32[1,32], index: 3, kind: input, shape index: {}]   ;;  %s3139_s4 = inlined_call_operand.vmem [shape: f32[2,1,32], index: 4, kind: input, shape index: {}]   ;;  %s3140_s5 = inlined_call_operand.vmem [shape: f32[2,1,32], index: 5, kind: input, shape index: {}]   ;;  %s3141_s6 = inlined_call_operand.vmem [shape: bf16[2,32,96], index: 6, kind: input, shape index: {}]   ;;  %s3142_s7 = inlined_call_operand.vmem [shape: f32[2,1,96], index: 7, kind: input, shape index: {}]   ;;  %s3143_s8 = inlined_call_operand.vmem [shape: bf16[2,32,32], index: 8, kind: input, shape index: {}]   ;;  %s3144_s9 = inlined_call_operand.vmem [shape: f32[2,1,32], index: 9, kind: input, shape index: {}]   ;;  %s3145_s10 = inlined_call_operand.vmem [shape: f32[2,1,32], index: 10, kind: input, shape index: {}]   ;;  %s3146_s11 = inlined_call_operand.vmem [shape: f32[2,1,32], index: 11, kind: input, shape index: {}]   ;;  %s3147_s12 = inlined_call_operand.vmem [shape: bf16[2,32,128], index: 12, kind: input, shape index: {}]   ;;  %s3148_s13 = inlined_call_operand.vmem [shape: f32[2,1,128], index: 13, kind: input, shape index: {}]   ;;  %s3149_s14 = inlined_call_operand.vmem [shape: bf16[2,128,32], index: 14, kind: input, shape index: {}]   ;;  %s3150_s15 = inlined_call_operand.vmem [shape: f32[2,1,32], index: 15, kind: input, shape index: {}]   ;;  %s3151_s16 = inlined_call_operand.vmem [shape: f32[1,32], index: 16, kind: input, shape index: {}]   ;;  %s3152_s17 = inlined_call_operand.vmem [shape: f32[1,32], index: 17, kind: input, shape index: {}]   ;;  %s3153_s18 = inlined_call_operand.vmem [shape: bf16[32,16], index: 18, kind: input, shape index: {}]   ;;  %s3154_s19 = inlined_call_operand.hbm [shape: f32[2,1,16], index: 19, kind: output, shape index: {}]  }
   0x1   :  { %3170 = sst [smem:[#allocation19_spill]] %s3135_s0 }
   0x2   :  { %3171 = sst [smem:[#allocation20_spill]] %s3136_s1 }
   0x3   :  { %3172 = sst [smem:[#allocation21_spill]] %s3137_s2 }
   0x4   :  { %3173 = sst [smem:[#allocation22_spill]] %s3138_s3 }
   0x5   :  { %3174 = sst [smem:[#allocation23_spill]] %s3140_s5 }
   0x6   :  { %3175 = sst [smem:[#allocation24_spill]] %s3141_s6 }
   0x7   :  { %3176 = sst [smem:[#allocation25_spill]] %s3143_s8 }
   0x8   :  { %3177 = sst [smem:[#allocation26_spill]] %s3151_s16 }
   0x9   :  { %3178 = sst [smem:[#allocation27_spill]] %s3152_s17 }
   0xa   :  { %3179 = sst [smem:[#allocation28_spill]] %s3153_s18 }
   0xb   :  { %3180 = sst [smem:[#allocation29_spill]] %s3154_s19 }
   0xc   :  { %24 = vsyncpa [#allocation5], 0 }
   0xd   :  { %26 = vsyncpa [#allocation5 + $0x1], 0  ;;  %s2730_s0 = smov 0   ;;  %s2732_s30 = smov 0  }
   0xe   :  { %s2734_s20 = smov 0   ;;  %s2736_s21 = smov 0  }
   0xf   :  { %s2738_s1 = smov 0   ;;  %s2740_s22 = smov 0  }
  0x10   :  { %s2742_s2 = smov 0   ;;  %s2744_s23 = smov 0  }
  0x11 LB: > { %3181 = sst [smem:[#allocation7_spill]] %s2581_s0  ;;  %s2140_s24 = sadd.s32 4294967295, %s2609_s23   ;;  %s2609_s23 = sphi %s2744_s23, %s32_s23   ;;  %s2605_s2 = sphi %s2742_s2, %s3227_s2   ;;  %s2601_s22 = sphi %s2740_s22, %s3226_s22   ;;  %s2597_s1 = sphi %s2738_s1, %s3225_s1   ;;  %s2593_s21 = sphi %s2736_s21, %s3224_s21   ;;  %s2589_s20 = sphi %s2734_s20, %s3230_s20   ;;  %s2585_s30 = sphi %s2732_s30, %s3229_s30   ;;  %s2581_s0 = sphi %s2730_s0, %s3228_s0  }
  0x12   : > { %3182 = sst [smem:[#allocation8_spill]] %s2589_s20  ;;  %s2141_s25 = sadd.s32 4294967294, %s2609_s23  }
  0x13   : > { %3183 = sst [smem:[#allocation9_spill]] %s2593_s21  ;;  %s41_s3 = sadd.s32 1, %s2601_s22 }
  0x14   : > { %3184 = sst [smem:[#allocation10_spill]] %s2597_s1  ;;  %p42_p0 = scmp.ge.s32.totalorder %s41_s3, 2 }
  0x15   : > { %3185 = sst [smem:[#allocation11_spill]] %s2601_s22  ;;  %s44_s26 = sadd.s32 1, %s2605_s2 }
  0x16   : > { %3186 = sst [smem:[#allocation12_spill]] %s2605_s2  ;;  %p525_p1 = scmp.ne.s32.totalorder %s2589_s20, %s2585_s30 }
  0x17   : > { %3187 = sst [smem:[#allocation13_spill]] %s2609_s23  ;;  %p526_p2 = scmp.eq.s32.totalorder %s2140_s24, 3 }
  0x18   : > { %s3232_s3 = smov (%p42_p0, %s41_s3), 0  ;;  %s3234_s26 = smov (!%p42_p0, %s44_s26), %s2605_s2 }
  0x19   : > { %3188 = sst [smem:[#allocation14_spill]] %s3232_s3  ;;  %p2779_p3 = por %p526_p2, %p525_p1 }
  0x1a   : > { %p531_p4 = scmp.ne.s32.totalorder %s2585_s30, %s2581_s0  ;;  %p46_p5 = scmp.ge.s32.totalorder %s3234_s26, 2 }
  0x1b   : > { %s3189_s27 = scalar_select %p2779_p3, 1, 0 }
  0x1c   : > { %p532_p6 = scmp.eq.s32.totalorder %s2141_s25, 3  ;;  %p2144_p7 = scmp.ge.s32.totalorder %s2609_s23, 1 }
  0x1d   : > { %3190 = sst [smem:[#allocation15_spill]] %s3189_s27  ;;  %p656_p8 = scmp.lt.s32.totalorder %s2609_s23, 5 }
  0x1e   : > { %s3236_s26 = smov (%p46_p5, %s3234_s26), 0  ;;  %p2789_p9 = por %p532_p6, %p531_p4 }
  0x1f   : > { %3191 = sst [smem:[#allocation16_spill]] %s3236_s26  ;;  %p657_p10 = pnand %p2144_p7, %p656_p8 }
  0x20   : > { %s3192_s28 = scalar_select %p2789_p9, 1, 0 }
  0x21   : > { %s512_s29 = ssub.s32 %s2605_s2, %s3236_s26  ;;  %s515_s24 = sadd.s32 1, %s2589_s20 }
  0x22   : > { %3193 = sst [smem:[#allocation17_spill]] %s3192_s28  ;;  %p513_p11 = scmp.eq.s32.totalorder %s512_s29, 0 }
  0x23   : > { %660 = sbr.rel (%p657_p10) target bundleno = 3354 (0xd1a), region = 96  ;;  %p755_p12 = scmp.lt.s32.totalorder (!%p657_p10), %s2597_s1, 1 }
  0x24   : > { %s2797_s3 = scalar_select %p513_p11, %s2589_s20, %s515_s24  }
  0x25   : > { %p760_p13 = scmp.lt.s32.totalorder (!%p657_p10), %s2593_s21, 1  ;;  %s3195_s2 = sld [smem:[#allocation19_spill]] (!%p657_p10) }
  0x26   : > { %3194 = sst [smem:[#allocation18_spill]] %s2797_s3  ;;  %s3199_s16 = sand.u32 (!%p657_p10), 1, %s2585_s30  }
  0x27   : > { %s3197_s6 = sld [smem:[#allocation24_spill]] (!%p657_p10)  ;;  %s2865_s17 = scalar_lea.vmem (!%p657_p10), [#allocation4], %s3199_s16 }
  0x28   : > { %s756_s22 = scalar_select %p755_p12, %s2597_s1, 1 }
  0x29   : > { %s2804_s0 = scalar_select %p760_p13, %s2593_s21, 1 }
  0x2a   : > { %s2207_s29 = sshll.u32 %s756_s22, 3  ;;  %s3198_s8 = sld [smem:[#allocation25_spill]] }
  0x2b   : > { %s759_s25 = scalar_lea.vmem %s3195_s2, %s2207_s29  ;;  %s2208_s1 = sshll.u32 %s2804_s0, 4 }
  0x2c   : > { %s2847_s22 = scalar_lea.vmem %s3147_s12, %s2208_s1  ;;  %s803_s19 = scalar_lea.vmem %s3150_s15, %s2804_s0 }
  0x2d   : > { %s2821_s18 = scalar_lea.vmem %s3197_s6, %s2208_s1  ;;  %s787_s6 = scalar_lea.vmem %s3146_s11, %s2804_s0 }
  0x2e   : > { %s3200_s5 = sld [smem:[#allocation9_spill]] }
  0x30   : > { %s2830_s29 = scalar_lea.vmem %s3198_s8, %s2208_s1  ;;  %s2211_s8 = sshll.u32 %s2804_s0, 6 }
  0x31   : > { %s2861_s28 = scalar_lea.vmem %s3149_s14, %s2211_s8 }
  0x34   : > { %p2155_p0 = scmp.ne.s32.totalorder %s3200_s5, 0 }
  0x35   : > { %s3201_s24 = sld [smem:[#allocation20_spill]] (!%p2155_p0) }
  0x36   : > { %808 = sbr.rel (%p2155_p0) target bundleno = 377 (0x179), region = 100  ;;  %s3202_s26 = sld [smem:[#allocation21_spill]] (!%p2155_p0) }
  0x37   : > { %s3203_s27 = sld [smem:[#allocation22_spill]] (!%p2155_p0) }
  0x3b   : > { %v2221_v0 = vld [vmem:[%s759_s25] sm:$0xff]   ;;  %v814_v2 = vld [vmem:[%s3201_s24 + $0x8] sm:$0xff]  ;;  %vm819_vm0 = vcmask 261120  }
  0x3c   : > { %v813_v1 = vld [vmem:[%s3201_s24] sm:$0xff]  ;;  %v2222_v3 = vunpack.c.l.bf16 %v2221_v0  ;;  %v2223_v4 = vunpack.c.h.bf16 %v2221_v0 }
  0x3d   : > { %v2156_v26 = vld [vmem:[%s3202_s26] ss:$0 sm:$0xff] }
  0x3e   : > { %v815_v5 = vadd.f32 %v2222_v3, %v813_v1  ;;  %v816_v6 = vadd.f32 %v2223_v4, %v814_v2  ;;  %v2157_v28 = vld [vmem:[%s3203_s27] ss:$0 sm:$0xff] }
  0x40   : > { %v820_v7 = vsel %vm819_vm0, %v815_v5, 0.0  ;;  %v823_v8 = vsel %vm819_vm0, %v816_v6, 0.0 }
  0x41   : > { %821 = vadd.xlane.f32.xlu0 %v820_v7 }
  0x45   : > { %824 = vadd.xlane.f32.xlu0 %v823_v8 }
  0xca   : > { %v822_v9 = vpop.xlane.xlu0 %821 }
  0xcb   : > { %v827_v10 = vmul.f32 0.03125, %v822_v9 }
  0xcd   : > { %v829_v11 = vsub.f32 %v815_v5, %v827_v10 }
  0xce   : > { %v825_v12 = vpop.xlane.xlu0 %824 }
  0xcf   : > { %v828_v13 = vmul.f32 0.03125, %v825_v12  ;;  %v831_v14 = vmul.f32 %v829_v11, %v829_v11 }
  0xd1   : > { %v830_v15 = vsub.f32 %v816_v6, %v828_v13  ;;  %v833_v16 = vsel %vm819_vm0, %v831_v14, 0.0 }
  0xd2   : > { %834 = vadd.xlane.f32.xlu1 %v833_v16 }
  0xd3   : > { %v832_v17 = vmul.f32 %v830_v15, %v830_v15 }
  0xd5   : > { %v836_v18 = vsel %vm819_vm0, %v832_v17, 0.0 }
  0xd6   : > { %837 = vadd.xlane.f32.xlu1 %v836_v18 }
 0x15b   : > { %v835_v19 = vpop.xlane.xlu1 %834 }
 0x15c   : > { %v839_v20 = vmul.f32 0.03125, %v835_v19 }
 0x15e   : > { %v841_v21 = vadd.f32 1e-05, %v839_v20 }
 0x15f   : > { %v838_v22 = vpop.xlane.xlu1 %837 }
 0x160   : > { %2450 = vrsqrt.f32 %v841_v21  ;;  %v840_v23 = vmul.f32 0.03125, %v838_v22 }
 0x162   : > { %v842_v24 = vadd.f32 1e-05, %v840_v23 }
 0x164   : > { %2452 = vrsqrt.f32 %v842_v24 }
 0x16d   : > { %v2451_v25 = vpop.eup %2450 }
 0x16e   : > { %v845_v27 = vmul.f32 %v2451_v25, %v829_v11 }
 0x170   : > { %v853_v29 = vmul.f32 %v2156_v26, %v845_v27 }
 0x171   : > { %v2453_v30 = vpop.eup %2452 }
 0x172   : > { %v861_v31 = vadd.f32 %v2157_v28, %v853_v29  ;;  %v846_v32 = vmul.f32 %v2453_v30, %v830_v15 }
 0x174   : > { %863 = vst.msk [vmem:[#allocation2] sm:$0xff] %vm819_vm0, %v861_v31  ;;  %v854_v33 = vmul.f32 %v2156_v26, %v846_v32 }
 0x176   : > { %v862_v34 = vadd.f32 %v2157_v28, %v854_v33 }
 0x178   : > { %864 = vst.msk [vmem:[#allocation2 + $0x8] sm:$0xff] %vm819_vm0, %v862_v34 }
 0x179 PF: > { %vm869_vm1 = vcmask 261120   ;;  %v2454_v49 = vld [vmem:[%s2821_s18 + $0x8] sm:$0xff]   ;;  %v2611_v50 = vmov 0.0   ;;  %vm2612_vm2 = vmmov 0   ;;  %v2455_v51 = vld [vmem:[%s2821_s18] sm:$0xff]   ;;  %s3204_s16 = scalar_lea.vmem %s3139_s4, %s2804_s0  ;;  %s3205_s21 = sld [smem:[#allocation23_spill]]  ;;  %v982_v24 = vlaneseq }
 0x17a   : > { %2261 = vmatprep.subr.bf16.mxu0 %v2611_v50  ;;  %2265 = vmatprep.mubr.msk.bf16.mxu0 %vm2612_vm2, %v2611_v50  ;;  %v2158_v60 = vld [vmem:[%s3204_s16] ss:$0 sm:$0xff]  ;;  %s3207_s26 = scalar_lea.vmem %s3142_s7, %s2804_s0  ;;  %s2613_s20 = smov 88   ;;  %vm988_vm3 = vcmask 64512   ;;  %vm1038_vm5 = vcmask 130048   ;;  %vm1117_vm6 = vcmask 60416  }
 0x17b   : > { %v2886_v35 = vld [vmem:[#allocation2] sm:$0xff]  ;;  %2262 = vmatpush3.bf16.msra.mxu0 %v2454_v49  ;;  %2281 = vmatprep.subr.bf16.mxu1 %v2611_v50  ;;  %s2614_s3 = smov 96   ;;  %s2615_s27 = smov 120   ;;  %v983_v25 = vand.u32 127, %v982_v24  ;;  %vm1255_vm7 = vcmask 126016   ;;  %vm1393_vm8 = vcmask 191616  }
 0x17c   : > { %v870_v37 = vsel %vm869_vm1, %v2886_v35, 0.0  ;;  %2263 = vmatprep.subr.bf16.mxu0 %v2611_v50  ;;  %2283 = vmatprep.mubr.msk.bf16.mxu1 %vm2612_vm2, %v2611_v50  ;;  %v2160_v6 = vld [vmem:[%s3207_s26] ss:$0 sm:$0xff]  ;;  %s2616_s18 = smov 112   ;;  %s2617_s23 = smov 80   ;;  %vm1531_vm9 = vcmask 257216  }
 0x17d   : > { %871 = vadd.xlane.f32.xlu0 %v870_v37  ;;  %s2618_s16 = smov 104   ;;  %s2619_s5 = smov 72   ;;  %vm984_vm4 = vcmp.lt.s32.totalorder %v983_v25, 5 }
 0x17e   : > { %s2620_s1 = smov 64   ;;  %s2623_s8 = smov 56  }
 0x17f   : > { %v2888_v36 = vld [vmem:[#allocation2 + $0x8] sm:$0xff]  ;;  %2264 = vmatpush3.bf16.msra.mxu0 %v2455_v51  ;;  %s3206_s2 = scalar_lea.vmem %s3205_s21, %s2804_s0  ;;  %s2621_s21 = smov 48  }
 0x180   : > { %v873_v38 = vsel %vm869_vm1, %v2888_v36, 0.0  ;;  %2269 = vmatprep.subr.bf16.mxu0 %v2611_v50  ;;  %v2159_v0 = vld [vmem:[%s3206_s2] ss:$0 sm:$0xff]  ;;  %s2622_s2 = smov 40   ;;  %s2624_s25 = smov 8  }
 0x181   : > { %874 = vadd.xlane.f32.xlu0 %v873_v38  ;;  %s2625_s26 = smov 16  }
 0x206   : > { %v872_v39 = vpop.xlane.xlu0 %871 }
 0x207   : > { %v877_v40 = vmul.f32 0.03125, %v872_v39 }
 0x209   : > { %v879_v41 = vsub.f32 %v2886_v35, %v877_v40 }
 0x20a   : > { %v875_v42 = vpop.xlane.xlu0 %874 }
 0x20b   : > { %v878_v43 = vmul.f32 0.03125, %v875_v42  ;;  %v881_v44 = vmul.f32 %v879_v41, %v879_v41 }
 0x20d   : > { %v880_v45 = vsub.f32 %v2888_v36, %v878_v43  ;;  %v883_v46 = vsel %vm869_vm1, %v881_v44, 0.0 }
 0x20e   : > { %884 = vadd.xlane.f32.xlu1 %v883_v46 }
 0x20f   : > { %v882_v47 = vmul.f32 %v880_v45, %v880_v45 }
 0x211   : > { %v886_v48 = vsel %vm869_vm1, %v882_v47, 0.0 }
 0x212   : > { %887 = vadd.xlane.f32.xlu1 %v886_v48 }
 0x297   : > { %v885_v52 = vpop.xlane.xlu1 %884 }
 0x298   : > { %v889_v53 = vmul.f32 0.03125, %v885_v52 }
 0x29a   : > { %v891_v54 = vadd.f32 1e-05, %v889_v53 }
 0x29b   : > { %v888_v55 = vpop.xlane.xlu1 %887 }
 0x29c   : > { %2469 = vrsqrt.f32 %v891_v54  ;;  %v890_v56 = vmul.f32 0.03125, %v888_v55 }
 0x29e   : > { %v892_v57 = vadd.f32 1e-05, %v890_v56 }
 0x2a0   : > { %2471 = vrsqrt.f32 %v892_v57 }
 0x2a9   : > { %v2470_v58 = vpop.eup %2469 }
 0x2aa   : > { %v895_v59 = vmul.f32 %v2470_v58, %v879_v41 }
 0x2ac   : > { %v903_v63 = vmul.f32 %v2158_v60, %v895_v59 }
 0x2ad   : > { %v2472_v61 = vpop.eup %2471 }
 0x2ae   : > { %v896_v62 = vmul.f32 %v2472_v61, %v880_v45  ;;  %v911_v2 = vadd.f32 %v2159_v0, %v903_v63 }
 0x2b0   : > { %v904_v1 = vmul.f32 %v2158_v60, %v896_v62 }
 0x2b2   : > { %v912_v3 = vadd.f32 %v2159_v0, %v904_v1 }
 0x2b4   : > { %v913_v4 = vpack.c.bf16 %v912_v3, %v911_v2 }
 0x2b6   : > { %2266 = vmatmul.mubr.msk.bf16.vlgmr.msra.gmra.mxu0 %vm869_vm1, %v913_v4 }
 0x2b7   : > { %2271 = vmatprep.mubr.msk.bf16.mxu0 %vm2612_vm2, %v2611_v50 }
 0x376   : > { %v974_v5 = vpop.f32.mrf.mxu0 }
 0x377   : > { %v975_v9 = vadd.f32 %v2160_v6, %v974_v5 }
 0x378   : > { %v2267_v7 = vpop.f32.mrf.mxu0 }
 0x37a   : > { %v977_v8 = vpop.f32.mrf.mxu0 }
 0x37b   : > { %v978_v10 = vadd.f32 %v2160_v6, %v977_v8 }
 0x37c   : > { %v2268_v11 = vpop.f32.mrf.mxu0 }
 0x37d   : > { %v2926_v12 = vpack.c.bf16 %v978_v10, %v975_v9 }
 0x37f   : > { %1122 = vrot.lane.b32.xlu1 %v2926_v12, %s2613_s20  ;;  %986 = vrot.lane.b32.xlu0 %v2926_v12, %s2614_s3  ;;  %s2626_s20 = smov 24  }
 0x383   : > { %1120 = vrot.lane.b32.xlu1 %v2926_v12, %s2615_s27  ;;  %1258 = vrot.lane.b32.xlu0 %v2926_v12, %s2616_s18  ;;  %s3208_s27 = scalar_lea.vmem %s3144_s9, %s2804_s0 }
 0x387   : > { %1260 = vrot.lane.b32.xlu1 %v2926_v12, %s2617_s23  ;;  %1396 = vrot.lane.b32.xlu0 %v2926_v12, %s2618_s16 }
 0x38b   : > { %1398 = vrot.lane.b32.xlu1 %v2926_v12, %s2619_s5 }
 0x3f1   : > { %v1123_v13 = vpop.permute.xlu1 %1122  ;;  %v987_v14 = vpop.permute.xlu0 %986 }
 0x3f2   : > { %v993_v15 = vsel %vm988_vm3, %v987_v14, 0  ;;  %v1128_v16 = vsel %vm988_vm3, %v1123_v13, 0 }
 0x3f3   : > { %2270 = vmatpush3.bf16.xpose.msra.mxu0 %v993_v15  ;;  %2282 = vmatpush3.bf16.xpose.msra.mxu1 %v1128_v16 }
 0x3f4   : > { %2293 = vmatprep.subr.bf16.mxu1 %v2611_v50  ;;  %2275 = vmatprep.subr.bf16.mxu0 %v2611_v50 }
 0x3f5   : > { %v1121_v17 = vpop.permute.xlu1 %1120  ;;  %v1259_v21 = vpop.permute.xlu0 %1258 }
 0x3f9   : > { %v1261_v18 = vpop.permute.xlu1 %1260  ;;  %v1397_v23 = vpop.permute.xlu0 %1396 }
 0x3fa   : > { %v1266_v19 = vsel %vm988_vm3, %v1261_v18, 0  ;;  %2272 = vmatmul.mubr.msk.bf16.vlgmr.msra.gmra.mxu0 %vm988_vm3, %v2926_v12  ;;  %2284 = vmatmul.mubr.msk.bf16.vlgmr.msra.gmra.mxu1 %vm988_vm3, %v1121_v17 }
 0x3fb   : > { %2294 = vmatpush3.bf16.xpose.msra.mxu1 %v1266_v19  ;;  %2295 = vmatprep.mubr.msk.bf16.mxu1 %vm2612_vm2, %v2611_v50 }
 0x3fc   : > { %2305 = vmatprep.subr.bf16.mxu1 %v2611_v50  ;;  %2277 = vmatprep.mubr.msk.bf16.mxu0 %vm2612_vm2, %v2611_v50 }
 0x3fd   : > { %v1399_v20 = vpop.permute.xlu1 %1398 }
 0x3fe   : > { %v1404_v22 = vsel %vm988_vm3, %v1399_v20, 0 }
 0x402   : > { %2296 = vmatmul.mubr.msk.bf16.vlgmr.msra.gmra.mxu1 %vm988_vm3, %v1259_v21 }
 0x403   : > { %2306 = vmatpush3.bf16.xpose.msra.mxu1 %v1404_v22  ;;  %2307 = vmatprep.mubr.msk.bf16.mxu1 %vm2612_vm2, %v2611_v50 }
 0x404   : > { %2317 = vmatprep.subr.bf16.mxu1 %v2611_v50 }
 0x40a   : > { %2308 = vmatmul.mubr.msk.bf16.vlgmr.msra.gmra.mxu1 %vm988_vm3, %v1397_v23 }
 0x40b   : > { %2321 = vmatprep.mubr.msk.bf16.mxu1 %vm2612_vm2, %v2611_v50 }
 0x4ba   : > { %v1029_v26 = vpop.f32.mrf.mxu0  ;;  %v1164_v27 = vpop.f32.mrf.mxu1 }
 0x4bb   : > { %v1036_v28 = vsel %vm984_vm4, %v1029_v26, -1e+30  ;;  %v1171_v40 = vsel %vm984_vm4, %v1164_v27, -1e+30 }
 0x4bc   : > { %v2273_v29 = vpop.f32.mrf.mxu0  ;;  %v2285_v30 = vpop.f32.mrf.mxu1  ;;  %v1039_v31 = vsel %vm1038_vm5, %v1036_v28, -inf  ;;  %v1173_v45 = vsel %vm1038_vm5, %v1171_v40, -inf }
 0x4bd   : > { %1040 = vmax.xlane.f32.xlu1 %v1039_v31 }
 0x4be   : > { %v1032_v32 = vpop.f32.mrf.mxu0  ;;  %v1167_v33 = vpop.f32.mrf.mxu1 }
 0x4bf   : > { %v1037_v34 = vsel %vm984_vm4, %v1032_v32, -1e+30  ;;  %v1172_v46 = vsel %vm984_vm4, %v1167_v33, -1e+30 }
 0x4c0   : > { %v2274_v37 = vpop.f32.mrf.mxu0  ;;  %v2286_v38 = vpop.f32.mrf.mxu1  ;;  %v1042_v39 = vsel %vm1038_vm5, %v1037_v34, -inf  ;;  %v1176_v49 = vsel %vm1038_vm5, %v1172_v46, -inf }
 0x4c1   : > { %1043 = vmax.xlane.f32.xlu0 %v1042_v39 }
 0x4c2   : > { %v1302_v41 = vpop.f32.mrf.mxu1 }
 0x4c3   : > { %v1309_v42 = vsel %vm984_vm4, %v1302_v41, -1e+30 }
 0x4c4   : > { %v2297_v43 = vpop.f32.mrf.mxu1  ;;  %v1311_v44 = vsel %vm1038_vm5, %v1309_v42, -inf }
 0x4c5   : > { %1312 = vmax.xlane.f32.xlu1 %v1311_v44  ;;  %1174 = vmax.xlane.f32.xlu0 %v1173_v45 }
 0x4c6   : > { %v1305_v47 = vpop.f32.mrf.mxu1 }
 0x4c7   : > { %v1310_v51 = vsel %vm984_vm4, %v1305_v47, -1e+30 }
 0x4c8   : > { %v2298_v48 = vpop.f32.mrf.mxu1  ;;  %v1314_v56 = vsel %vm1038_vm5, %v1310_v51, -inf }
 0x4c9   : > { %1177 = vmax.xlane.f32.xlu0 %v1176_v49 }
 0x4ca   : > { %v1440_v52 = vpop.f32.mrf.mxu1 }
 0x4cb   : > { %v1447_v53 = vsel %vm984_vm4, %v1440_v52, -1e+30 }
 0x4cc   : > { %v2309_v54 = vpop.f32.mrf.mxu1  ;;  %v1449_v55 = vsel %vm1038_vm5, %v1447_v53, -inf }
 0x4cd   : > { %1450 = vmax.xlane.f32.xlu1 %v1449_v55  ;;  %1315 = vmax.xlane.f32.xlu0 %v1314_v56 }
 0x4ce   : > { %v1443_v57 = vpop.f32.mrf.mxu1 }
 0x4cf   : > { %v1448_v58 = vsel %vm984_vm4, %v1443_v57, -1e+30 }
 0x4d0   : > { %v2310_v59 = vpop.f32.mrf.mxu1  ;;  %v1452_v60 = vsel %vm1038_vm5, %v1448_v58, -inf }
 0x4d1   : > { %1453 = vmax.xlane.f32.xlu0 %v1452_v60 }
 0x4de   : > { %1062 = vrot.lane.b32.xlu1 %v2926_v12, %s2620_s1 }
 0x546   : > { %v1041_v61 = vpop.xlane.xlu1 %1040 }
 0x547   : > { %v1045_v62 = vsub.f32 %v1036_v28, %v1041_v61 }
 0x549   : > { %v1047_v63 = vmul.f32 1.442695, %v1045_v62 }
 0x54a   : > { %v1044_v0 = vpop.xlane.xlu0 %1043 }
 0x54b   : > { %2473 = vpow2.f32 %v1047_v63  ;;  %v1046_v1 = vsub.f32 %v1037_v34, %v1044_v0 }
 0x54d   : > { %v1049_v2 = vmul.f32 1.442695, %v1046_v1 }
 0x54e   : > { %v1313_v3 = vpop.xlane.xlu1 %1312  ;;  %v1175_v4 = vpop.xlane.xlu0 %1174 }
 0x54f   : > { %2475 = vpow2.f32 %v1049_v2  ;;  %v1317_v5 = vsub.f32 %v1309_v42, %v1313_v3  ;;  %v1179_v6 = vsub.f32 %v1171_v40, %v1175_v4 }
 0x551   : > { %v1181_v7 = vmul.f32 1.442695, %v1179_v6  ;;  %v1319_v8 = vmul.f32 1.442695, %v1317_v5 }
 0x552   : > { %v1178_v9 = vpop.xlane.xlu0 %1177 }
 0x553   : > { %v1180_v10 = vsub.f32 %v1172_v46, %v1178_v9  ;;  %2477 = vpow2.f32 %v1181_v7 }
 0x554   : > { %2479 = vpow2.f32 %v1319_v8 }
 0x555   : > { %v1183_v11 = vmul.f32 1.442695, %v1180_v10 }
 0x556   : > { %v1451_v13 = vpop.xlane.xlu1 %1450  ;;  %v1316_v14 = vpop.xlane.xlu0 %1315 }
 0x557   : > { %2481 = vpow2.f32 %v1183_v11  ;;  %v1455_v15 = vsub.f32 %v1447_v53, %v1451_v13  ;;  %v1318_v16 = vsub.f32 %v1310_v51, %v1316_v14 }
 0x558   : > { %v2474_v17 = vpop.eup %2473 }
 0x559   : > { %v1457_v18 = vmul.f32 1.442695, %v1455_v15  ;;  %v1321_v19 = vmul.f32 1.442695, %v1318_v16  ;;  %v1051_v20 = vsel %vm1038_vm5, %v2474_v17, 0.0 }
 0x55a   : > { %1052 = vadd.xlane.f32.xlu1 %v1051_v20  ;;  %v1063_v21 = vpop.permute.xlu1 %1062  ;;  %v1454_v22 = vpop.xlane.xlu0 %1453 }
 0x55b   : > { %2483 = vpow2.f32 %v1457_v18  ;;  %v1456_v23 = vsub.f32 %v1448_v58, %v1454_v22  ;;  %2276 = vmatpush3.bf16.msra.mxu0 %v1063_v21 }
 0x55c   : > { %v2476_v24 = vpop.eup %2475  ;;  %2485 = vpow2.f32 %v1321_v19  ;;  %2287 = vmatprep.subr.bf16.mxu0 %v2611_v50 }
 0x55d   : > { %v1459_v25 = vmul.f32 1.442695, %v1456_v23  ;;  %v1054_v26 = vsel %vm1038_vm5, %v2476_v24, 0.0 }
 0x55e   : > { %1055 = vadd.xlane.f32.xlu0 %v1054_v26  ;;  %v2457_v26 = vld [vmem:[%s2830_s29] sm:$0xff]  }
 0x55f   : > { %2487 = vpow2.f32 %v1459_v25 }
 0x560   : > { %v2478_v27 = vpop.eup %2477 }
 0x561   : > { %v1185_v28 = vsel %vm1038_vm5, %v2478_v27, 0.0  ;;  %v2480_v29 = vpop.eup %2479 }
 0x562   : > { %1186 = vadd.xlane.f32.xlu1 %v1185_v28  ;;  %v1323_v32 = vsel %vm1038_vm5, %v2480_v29, 0.0 }
 0x564   : > { %v2482_v30 = vpop.eup %2481 }
 0x565   : > { %v1188_v31 = vsel %vm1038_vm5, %v2482_v30, 0.0 }
 0x566   : > { %1189 = vadd.xlane.f32.xlu0 %v1188_v31  ;;  %1324 = vadd.xlane.f32.xlu1 %v1323_v32 }
 0x568   : > { %v2979_v33 = vpop.eup %2483 }
 0x569   : > { %v2486_v34 = vpop.eup %2485  ;;  %v1461_v37 = vsel %vm1038_vm5, %v2979_v33, 0.0 }
 0x56a   : > { %v1326_v38 = vsel %vm1038_vm5, %v2486_v34, 0.0  ;;  %1462 = vadd.xlane.f32.xlu1 %v1461_v37 }
 0x56b   : > { %1327 = vadd.xlane.f32.xlu0 %v1326_v38 }
 0x56c   : > { %v2488_v39 = vpop.eup %2487 }
 0x56d   : > { %v1464_v40 = vsel %vm1038_vm5, %v2488_v39, 0.0 }
 0x56f   : > { %1465 = vadd.xlane.f32.xlu0 %v1464_v40 }
 0x57b   : > { %1334 = vrot.lane.b32.xlu1 %v2926_v12, %s2621_s21  ;;  %s3210_s21 = scalar_lea.vmem %s3148_s13, %s2804_s0 }
 0x57f   : > { %1472 = vrot.lane.b32.xlu1 %v2926_v12, %s2622_s2 }
 0x585   : > { %1196 = vrot.lane.b32.xlu0 %v2926_v12, %s2623_s8  ;;  %s3211_s8 = sld [smem:[#allocation9_spill]] }
 0x58b   : > { %p2200_p1 = scmp.ne.s32.totalorder %s3211_s8, 1 }
 0x5e3   : > { %v1053_v41 = vpop.xlane.xlu1 %1052 }
 0x5e4   : > { %2489 = vrcp.f32 %v1053_v41 }
 0x5e7   : > { %v1056_v42 = vpop.xlane.xlu0 %1055 }
 0x5e8   : > { %2491 = vrcp.f32 %v1056_v42 }
 0x5eb   : > { %v1187_v43 = vpop.xlane.xlu1 %1186 }
 0x5ec   : > { %2493 = vrcp.f32 %v1187_v43 }
 0x5ef   : > { %v1190_v44 = vpop.xlane.xlu0 %1189  ;;  %v1325_v45 = vpop.xlane.xlu1 %1324 }
 0x5f0   : > { %2495 = vrcp.f32 %v1190_v44  ;;  %v2180_v44 = vld [vmem:[%s3208_s27] ss:$0 sm:$0xff]  ;;  %s3213_s27 = sld [smem:[#allocation26_spill]] (!%p2200_p1) }
 0x5f1   : > { %v2490_v46 = vpop.eup %2489  ;;  %2497 = vrcp.f32 %v1325_v45 }
 0x5f2   : > { %v1059_v49 = vmul.f32 %v2490_v46, %v2474_v17 }
 0x5f3   : > { %v1463_v54 = vpop.xlane.xlu1 %1462 }
 0x5f4   : > { %v1328_v47 = vpop.xlane.xlu0 %1327 }
 0x5f5   : > { %v2492_v48 = vpop.eup %2491  ;;  %2499 = vrcp.f32 %v1328_v47 }
 0x5f6   : > { %v1060_v51 = vmul.f32 %v2492_v48, %v2476_v24  ;;  %v2456_v24 = vld [vmem:[%s2830_s29 + $0x8] sm:$0xff]  }
 0x5f7   : > { %v1335_v61 = vpop.permute.xlu1 %1334  ;;  %2318 = vmatpush3.bf16.msra.mxu1 %v2456_v24  ;;  %v2466_v24 = vld [vmem:[%s2861_s28 + $0x10] sm:$0xff]  }
 0x5f8   : > { %v1466_v52 = vpop.xlane.xlu0 %1465  ;;  %v1061_v53 = vpack.c.bf16 %v1060_v51, %v1059_v49  ;;  %2319 = vmatprep.subr.bf16.mxu1 %v2611_v50 }
 0x5f9   : > { %v2494_v12 = vpop.eup %2493  ;;  %2501 = vrcp.f32 %v1466_v52 }
 0x5fa   : > { %2278 = vmatmul.mubr.msk.bf16.vlgmr.msra.gmra.mxu0 %vm1038_vm5, %v1061_v53  ;;  %2503 = vrcp.f32 %v1463_v54  ;;  %v1193_v57 = vmul.f32 %v2494_v12, %v2478_v27 }
 0x5fb   : > { %2289 = vmatprep.mubr.msk.bf16.mxu0 %vm2612_vm2, %v2611_v50  ;;  %v1473_v3 = vpop.permute.xlu1 %1472  ;;  %2320 = vmatpush3.bf16.msra.mxu1 %v2457_v26  ;;  %v2468_v26 = vld [vmem:[%s2861_s28] sm:$0xff]  }
 0x5fc   : > { %v1197_v55 = vpop.permute.xlu0 %1196  ;;  %2333 = vmatprep.subr.bf16.mxu1 %v2611_v50 }
 0x5fd   : > { %v2496_v56 = vpop.eup %2495  ;;  %2288 = vmatpush3.bf16.msra.mxu0 %v1197_v55 }
 0x5fe   : > { %2299 = vmatprep.subr.bf16.mxu0 %v2611_v50  ;;  %v1194_v58 = vmul.f32 %v2496_v56, %v2482_v30  ;;  %v2498_v60 = vpop.eup %2497 }
 0x5ff   : > { %v1331_v0 = vmul.f32 %v2498_v60, %v2480_v29 }
 0x600   : > { %v1195_v59 = vpack.c.bf16 %v1194_v58, %v1193_v57 }
 0x602   : > { %2290 = vmatmul.mubr.msk.bf16.vlgmr.msra.gmra.mxu0 %vm1038_vm5, %v1195_v59  ;;  %v2500_v62 = vpop.eup %2499 }
 0x603   : > { %2300 = vmatpush3.bf16.msra.mxu0 %v1335_v61  ;;  %2301 = vmatprep.mubr.msk.bf16.mxu0 %vm2612_vm2, %v2611_v50  ;;  %v1332_v63 = vmul.f32 %v2500_v62, %v2486_v34 }
 0x604   : > { %2311 = vmatprep.subr.bf16.mxu0 %v2611_v50 }
 0x605   : > { %v1333_v1 = vpack.c.bf16 %v1332_v63, %v1331_v0  ;;  %v2459_v63 = vld [vmem:[%s2847_s22 + $0x8] sm:$0xff]   ;;  %v2460_v0 = vld [vmem:[%s2847_s22] sm:$0xff]   ;;  %s3209_s22 = scalar_lea.vmem %s3145_s10, %s2804_s0 }
 0x606   : > { %v2502_v2 = vpop.eup %2501 }
 0x607   : > { %v2504_v4 = vpop.eup %2503  ;;  %v1470_v5 = vmul.f32 %v2502_v2, %v2488_v39 }
 0x608   : > { %v1469_v6 = vmul.f32 %v2504_v4, %v2979_v33 }
 0x60a   : > { %2302 = vmatmul.mubr.msk.bf16.vlgmr.msra.gmra.mxu0 %vm1038_vm5, %v1333_v1  ;;  %v1471_v7 = vpack.c.bf16 %v1470_v5, %v1469_v6 }
 0x60b   : > { %2312 = vmatpush3.bf16.msra.mxu0 %v1473_v3  ;;  %2313 = vmatprep.mubr.msk.bf16.mxu0 %vm2612_vm2, %v2611_v50 }
 0x60c   : > { %2325 = vmatprep.subr.bf16.mxu0 %v2611_v50 }
 0x612   : > { %2314 = vmatmul.mubr.msk.bf16.vlgmr.msra.gmra.mxu0 %vm1038_vm5, %v1471_v7 }
 0x613   : > { %2329 = vmatprep.mubr.msk.bf16.mxu0 %vm2612_vm2, %v2611_v50  ;;  %2326 = vmatpush3.bf16.msra.mxu0 %v2459_v63 }
 0x614   : > { %2327 = vmatprep.subr.bf16.mxu0 %v2611_v50 }
 0x617   : > { %2328 = vmatpush3.bf16.msra.mxu0 %v2460_v0 }
 0x6ba   : > { %v1102_v8 = vpop.f32.mrf.mxu0 }
 0x6bb   : > { %v2212_v9 = vpack.c.bf16 %v1102_v8, %v1102_v8 }
 0x6bc   : > { %v2279_v10 = vpop.f32.mrf.mxu0 }
 0x6bd   : > { %1118 = vst.msk [vmem:[#allocation3] sm:$0xf] %vm1117_vm6, %v2212_v9  ;;  %v2185_v9 = vld [vmem:[%s3209_s22] ss:$0 sm:$0xff]  ;;  %s3214_s22 = sld [smem:[#allocation27_spill]] (!%p2200_p1) }
 0x6be   : > { %v1105_v11 = vpop.f32.mrf.mxu0 }
 0x6bf   : > { %v2213_v13 = vpack.c.bf16 %v1105_v11, %v1105_v11 }
 0x6c0   : > { %v2280_v14 = vpop.f32.mrf.mxu0 }
 0x6c1   : > { %1119 = vst.msk [vmem:[#allocation3 + $0x4] sm:$0xf] %vm1117_vm6, %v2213_v13  ;;  %v2186_v14 = vld [vmem:[%s787_s6] ss:$0 sm:$0xff] }
 0x6c2   : > { %v1236_v15 = vpop.f32.mrf.mxu0 }
 0x6c3   : > { %v2214_v16 = vpack.c.bf16 %v1236_v15, %v1236_v15 }
 0x6c4   : > { %v2291_v17 = vpop.f32.mrf.mxu0 }
 0x6c5   : > { %1249 = vrot.lane.b32.xlu1 %v2214_v16, %s2624_s25 }
 0x6c6   : > { %v1239_v18 = vpop.f32.mrf.mxu0 }
 0x6c7   : > { %v2215_v19 = vpack.c.bf16 %v1239_v18, %v1239_v18 }
 0x6c8   : > { %v2292_v20 = vpop.f32.mrf.mxu0 }
 0x6c9   : > { %1251 = vrot.lane.b32.xlu0 %v2215_v19, %s2624_s25  ;;  %v2461_v19 = vld [vmem:[%s2861_s28 + $0x38] sm:$0xff]   ;;  %v2462_v20 = vld [vmem:[%s2861_s28 + $0x30] sm:$0xff]   ;;  %s3212_s25 = sld [smem:[#allocation28_spill]] (!%p2200_p1) }
 0x6ca   : > { %v1374_v21 = vpop.f32.mrf.mxu0 }
 0x6cb   : > { %v2216_v22 = vpack.c.bf16 %v1374_v21, %v1374_v21  ;;  %v2463_v21 = vld [vmem:[%s2861_s28 + $0x28] sm:$0xff]  }
 0x6cc   : > { %v2303_v23 = vpop.f32.mrf.mxu0 }
 0x6cd   : > { %1387 = vrot.lane.b32.xlu1 %v2216_v22, %s2625_s26  ;;  %v2464_v22 = vld [vmem:[%s2861_s28 + $0x20] sm:$0xff]   ;;  %v2465_v23 = vld [vmem:[%s2861_s28 + $0x18] sm:$0xff]  }
 0x6ce   : > { %v1377_v25 = vpop.f32.mrf.mxu0 }
 0x6cf   : > { %v2217_v27 = vpack.c.bf16 %v1377_v25, %v1377_v25  ;;  %v2467_v25 = vld [vmem:[%s2861_s28 + $0x8] sm:$0xff]  }
 0x6d0   : > { %v2304_v28 = vpop.f32.mrf.mxu0 }
 0x6d1   : > { %1389 = vrot.lane.b32.xlu0 %v2217_v27, %s2625_s26  ;;  %v2187_v27 = vld [vmem:[%s3210_s21] ss:$0 sm:$0xff] }
 0x6d2   : > { %v1512_v29 = vpop.f32.mrf.mxu0 }
 0x6d3   : > { %v2218_v30 = vpack.c.bf16 %v1512_v29, %v1512_v29 }
 0x6d4   : > { %v2315_v31 = vpop.f32.mrf.mxu0 }
 0x6d5   : > { %1525 = vrot.lane.b32.xlu1 %v2218_v30, %s2626_s20 }
 0x6d6   : > { %v1515_v32 = vpop.f32.mrf.mxu0 }
 0x6d7   : > { %v2219_v33 = vpack.c.bf16 %v1515_v32, %v1515_v32 }
 0x6d8   : > { %v2316_v34 = vpop.f32.mrf.mxu0 }
 0x6d9   : > { %1527 = vrot.lane.b32.xlu0 %v2219_v33, %s2626_s20 }
 0x737   : > { %v1250_v37 = vpop.permute.xlu1 %1249 }
 0x738   : > { %1256 = vst.msk [vmem:[#allocation3] sm:$0xf] %vm1255_vm7, %v1250_v37 }
 0x73b   : > { %v1252_v38 = vpop.permute.xlu0 %1251 }
 0x73c   : > { %1257 = vst.msk [vmem:[#allocation3 + $0x4] sm:$0xf] %vm1255_vm7, %v1252_v38 }
 0x73f   : > { %v1388_v39 = vpop.permute.xlu1 %1387 }
 0x740   : > { %1394 = vst.msk [vmem:[#allocation3] sm:$0xf] %vm1393_vm8, %v1388_v39 }
 0x743   : > { %v1390_v40 = vpop.permute.xlu0 %1389 }
 0x744   : > { %1395 = vst.msk [vmem:[#allocation3 + $0x4] sm:$0xf] %vm1393_vm8, %v1390_v40 }
 0x747   : > { %v1526_v41 = vpop.permute.xlu1 %1525 }
 0x748   : > { %1532 = vst.msk [vmem:[#allocation3] sm:$0xf] %vm1531_vm9, %v1526_v41 }
 0x74b   : > { %v1528_v42 = vpop.permute.xlu0 %1527 }
 0x74c   : > { %1533 = vst.msk [vmem:[#allocation3 + $0x4] sm:$0xf] %vm1531_vm9, %v1528_v42 }
 0x753   : > { %v2458_v43 = vld [vmem:[#allocation3] sm:$0xff]  }
 0x754   : > { %2322 = vmatmul.mubr.msk.bf16.vlgmr.msra.gmra.mxu1 %vm869_vm1, %v2458_v43 }
 0x755   : > { %2349 = vmatprep.mubr.msk.bf16.mxu1 %vm2612_vm2, %v2611_v50  ;;  %2334 = vmatpush3.bf16.msra.mxu1 %v2461_v19 }
 0x756   : > { %2335 = vmatprep.subr.bf16.mxu1 %v2611_v50 }
 0x759   : > { %2336 = vmatpush3.bf16.msra.mxu1 %v2462_v20 }
 0x75a   : > { %2337 = vmatprep.subr.bf16.mxu1 %v2611_v50 }
 0x75d   : > { %2338 = vmatpush3.bf16.msra.mxu1 %v2463_v21 }
 0x75e   : > { %2339 = vmatprep.subr.bf16.mxu1 %v2611_v50 }
 0x761   : > { %2340 = vmatpush3.bf16.msra.mxu1 %v2464_v22 }
 0x762   : > { %2341 = vmatprep.subr.bf16.mxu1 %v2611_v50 }
 0x765   : > { %2342 = vmatpush3.bf16.msra.mxu1 %v2465_v23 }
 0x766   : > { %2343 = vmatprep.subr.bf16.mxu1 %v2611_v50 }
 0x769   : > { %2344 = vmatpush3.bf16.msra.mxu1 %v2466_v24 }
 0x76a   : > { %2345 = vmatprep.subr.bf16.mxu1 %v2611_v50 }
 0x76d   : > { %2346 = vmatpush3.bf16.msra.mxu1 %v2467_v25 }
 0x76e   : > { %2347 = vmatprep.subr.bf16.mxu1 %v2611_v50 }
 0x771   : > { %2348 = vmatpush3.bf16.msra.mxu1 %v2468_v26 }
 0x814   : > { %v1601_v45 = vpop.f32.mrf.mxu1 }
 0x815   : > { %v1602_v46 = vadd.f32 %v2180_v44, %v1601_v45 }
 0x816   : > { %v2323_v47 = vpop.f32.mrf.mxu1 }
 0x817   : > { %v3017_v48 = vadd.f32 %v1602_v46, %v2886_v35 }
 0x818   : > { %v1604_v49 = vpop.f32.mrf.mxu1 }
 0x819   : > { %v1605_v51 = vadd.f32 %v2180_v44, %v1604_v49  ;;  %v1612_v52 = vsel %vm869_vm1, %v3017_v48, 0.0 }
 0x81a   : > { %1613 = vadd.xlane.f32.xlu1 %v1612_v52  ;;  %v2324_v53 = vpop.f32.mrf.mxu1 }
 0x81b   : > { %v3022_v12 = vadd.f32 %v1605_v51, %v2888_v36 }
 0x81d   : > { %v1615_v54 = vsel %vm869_vm1, %v3022_v12, 0.0 }
 0x81e   : > { %1616 = vadd.xlane.f32.xlu0 %v1615_v54 }
 0x8a3   : > { %v1614_v55 = vpop.xlane.xlu1 %1613 }
 0x8a4   : > { %v1618_v56 = vmul.f32 0.03125, %v1614_v55 }
 0x8a6   : > { %v1620_v35 = vsub.f32 %v3017_v48, %v1618_v56  ;;  %v2191_v56 = vld [vmem:[%s803_s19] ss:$0 sm:$0xff] }
 0x8a7   : > { %v1617_v57 = vpop.xlane.xlu0 %1616 }
 0x8a8   : > { %v1619_v58 = vmul.f32 0.03125, %v1617_v57  ;;  %v1622_v59 = vmul.f32 %v1620_v35, %v1620_v35 }
 0x8aa   : > { %v1621_v60 = vsub.f32 %v3022_v12, %v1619_v58  ;;  %v1624_v61 = vsel %vm869_vm1, %v1622_v59, 0.0 }
 0x8ab   : > { %1625 = vadd.xlane.f32.xlu0 %v1624_v61 }
 0x8ac   : > { %v1623_v62 = vmul.f32 %v1621_v60, %v1621_v60 }
 0x8ae   : > { %v1627_v36 = vsel %vm869_vm1, %v1623_v62, 0.0 }
 0x8af   : > { %1628 = vadd.xlane.f32.xlu0 %v1627_v36 }
 0x934   : > { %v1626_v1 = vpop.xlane.xlu0 %1625 }
 0x935   : > { %v1630_v2 = vmul.f32 0.03125, %v1626_v1 }
 0x937   : > { %v1632_v3 = vadd.f32 1e-05, %v1630_v2 }
 0x938   : > { %v1629_v4 = vpop.xlane.xlu0 %1628 }
 0x939   : > { %2505 = vrsqrt.f32 %v1632_v3  ;;  %v1631_v5 = vmul.f32 0.03125, %v1629_v4 }
 0x93b   : > { %v1633_v6 = vadd.f32 1e-05, %v1631_v5 }
 0x93d   : > { %2507 = vrsqrt.f32 %v1633_v6 }
 0x946   : > { %v2506_v7 = vpop.eup %2505 }
 0x947   : > { %v1636_v8 = vmul.f32 %v2506_v7, %v1620_v35 }
 0x949   : > { %v1644_v13 = vmul.f32 %v2185_v9, %v1636_v8 }
 0x94a   : > { %v2508_v10 = vpop.eup %2507 }
 0x94b   : > { %v1637_v11 = vmul.f32 %v2508_v10, %v1621_v60  ;;  %v1652_v16 = vadd.f32 %v2186_v14, %v1644_v13 }
 0x94d   : > { %v1645_v15 = vmul.f32 %v2185_v9, %v1637_v11 }
 0x94f   : > { %v1653_v17 = vadd.f32 %v2186_v14, %v1645_v15 }
 0x951   : > { %v1654_v18 = vpack.c.bf16 %v1653_v17, %v1652_v16 }
 0x953   : > { %2330 = vmatmul.mubr.msk.bf16.vlgmr.msra.gmra.mxu0 %vm869_vm1, %v1654_v18 }
 0xa13   : > { %v1715_v28 = vpop.f32.mrf.mxu0 }
 0xa14   : > { %v1716_v29 = vadd.f32 %v2187_v27, %v1715_v28 }
 0xa15   : > { %v2331_v30 = vpop.f32.mrf.mxu0 }
 0xa16   : > { %v1724_v31 = vmul.f32 0.044715, %v1716_v29  ;;  %v1722_v49 = vmul.f32 0.5, %v1716_v29 }
 0xa17   : > { %v1718_v32 = vpop.f32.mrf.mxu0 }
 0xa18   : > { %v1726_v33 = vmul.f32 %v1724_v31, %v1716_v29  ;;  %v1719_v34 = vadd.f32 %v2187_v27, %v1718_v32 }
 0xa19   : > { %v2332_v37 = vpop.f32.mrf.mxu0 }
 0xa1a   : > { %v1728_v38 = vmul.f32 %v1726_v33, %v1716_v29  ;;  %v1725_v39 = vmul.f32 0.044715, %v1719_v34  ;;  %v1723_v51 = vmul.f32 0.5, %v1719_v34 }
 0xa1c   : > { %v1730_v40 = vadd.f32 %v1728_v38, %v1716_v29  ;;  %v1727_v41 = vmul.f32 %v1725_v39, %v1719_v34 }
 0xa1e   : > { %v1732_v42 = vmul.f32 0.7978846, %v1730_v40  ;;  %v1729_v50 = vmul.f32 %v1727_v41, %v1719_v34 }
 0xa20   : > { %2509 = vtanh.f32 %v1732_v42  ;;  %v1731_v43 = vadd.f32 %v1729_v50, %v1719_v34 }
 0xa22   : > { %v1733_v44 = vmul.f32 0.7978846, %v1731_v43 }
 0xa24   : > { %2511 = vtanh.f32 %v1733_v44 }
 0xa2d   : > { %v2510_v45 = vpop.eup %2509 }
 0xa2e   : > { %v1736_v46 = vadd.f32 1.0, %v2510_v45 }
 0xa30   : > { %v1738_v53 = vmul.f32 %v1736_v46, %v1722_v49 }
 0xa31   : > { %v2512_v47 = vpop.eup %2511 }
 0xa32   : > { %v1737_v52 = vadd.f32 1.0, %v2512_v47 }
 0xa34   : > { %v1739_v54 = vmul.f32 %v1737_v52, %v1723_v51 }
 0xa36   : > { %v1740_v55 = vpack.c.bf16 %v1739_v54, %v1738_v53 }
 0xa38   : > { %2350 = vmatmul.mubr.bf16.vlgmr.msra.gmra.mxu1 %v1740_v55 }
 0xaf8   : > { %v1846_v35 = vpop.f32.mrf.mxu1 }
 0xaf9   : > { %v1847_v57 = vadd.f32 %v2191_v56, %v1846_v35 }
 0xafa   : > { %v2351_v58 = vpop.f32.mrf.mxu1 }
 0xafb   : > { %v1853_v59 = vadd.f32 %v1847_v57, %v3017_v48 }
 0xafc   : > { %v1849_v60 = vpop.f32.mrf.mxu1 }
 0xafd   : > { %1855 = vst.msk [vmem:[#allocation2] sm:$0xff] %vm869_vm1, %v1853_v59  ;;  %v1850_v61 = vadd.f32 %v2191_v56, %v1849_v60  ;;  %1860 = sbr.rel (%p2200_p1) target bundleno = 3328 (0xd00), region = 104 }
 0xafe   : > { %v2352_v62 = vpop.f32.mrf.mxu1 }
 0xaff   : > { %v1854_v36 = vadd.f32 %v1850_v61, %v3022_v12 }
 0xb01   : > { %1856 = vst.msk [vmem:[#allocation2 + $0x8] sm:$0xff] %vm869_vm1, %v1854_v36 }
 0xb02   : > { %vm1863_vm10 = vcmask 253952   ;;  %v2513_v4 = vld [vmem:[%s3212_s25 + $0x8] sm:$0xff]   ;;  %v2627_v5 = vmov 0.0   ;;  %vm2628_vm11 = vmmov 0   ;;  %v2514_v12 = vld [vmem:[%s3212_s25] sm:$0xff]   ;;  %vm1939_vm12 = vcmask 122880  }
 0xb03   : > { %v1864_v63 = vsel %vm1863_vm10, %v1853_v59, 0.0  ;;  %2353 = vmatprep.subr.bf16.mxu0 %v2627_v5  ;;  %2357 = vmatprep.mubr.msk.bf16.mxu0 %vm2628_vm11, %v2627_v5  ;;  %v1861_v10 = vld [vmem:[%s3213_s27] sm:$0x1] }
 0xb04   : > { %1865 = vadd.xlane.f32.xlu0 %v1864_v63  ;;  %2354 = vmatpush3.bf16.msra.mxu0 %v2513_v4  ;;  %v1862_v13 = vld [vmem:[%s3214_s22] sm:$0x1] }
 0xb05   : > { %2355 = vmatprep.subr.bf16.mxu0 %v2627_v5 }
 0xb08   : > { %2356 = vmatpush3.bf16.msra.mxu0 %v2514_v12 }
 0xb8d   : > { %v1866_v0 = vpop.xlane.xlu0 %1865 }
 0xb8e   : > { %v1867_v1 = vmul.f32 0.03125, %v1866_v0 }
 0xb90   : > { %v1868_v2 = vsub.f32 %v1853_v59, %v1867_v1 }
 0xb92   : > { %v1869_v3 = vmul.f32 %v1868_v2, %v1868_v2 }
 0xb94   : > { %v1870_v48 = vsel %vm1863_vm10, %v1869_v3, 0.0 }
 0xb95   : > { %1871 = vadd.xlane.f32.xlu0 %v1870_v48 }
 0xc1e   : > { %v1872_v6 = vpop.xlane.xlu0 %1871 }
 0xc1f   : > { %v1873_v7 = vmul.f32 0.03125, %v1872_v6 }
 0xc21   : > { %v1874_v8 = vadd.f32 1e-05, %v1873_v7 }
 0xc23   : > { %2515 = vrsqrt.f32 %v1874_v8 }
 0xc30   : > { %v2516_v9 = vpop.eup %2515 }
 0xc31   : > { %v1876_v11 = vmul.f32 %v2516_v9, %v1868_v2 }
 0xc33   : > { %v1877_v14 = vmul.f32 %v1876_v11, %v1861_v10 }
 0xc35   : > { %v1878_v15 = vadd.f32 %v1877_v14, %v1862_v13 }
 0xc37   : > { %v1879_v16 = vpack.c.bf16 %v1878_v15, %v1878_v15 }
 0xc39   : > { %2358 = vmatmul.mubr.msk.bf16.vlgmr.msra.gmra.mxu0 %vm869_vm1, %v1879_v16 }
 0xcf9   : > { %v1933_v17 = vpop.f32.mrf.mxu0 }
 0xcfa   : > { %1940 = vst.msk [vmem:[%s2865_s17] sm:$0x1] %vm1939_vm12, %v1933_v17 }
 0xcfb   : > { %v2359_v18 = vpop.f32.mrf.mxu0 }
 0xcfd   : > { %v1936_v19 = vpop.f32.mrf.mxu0 }
 0xcff   : > { %v2360_v20 = vpop.f32.mrf.mxu0 }
 0xd00 PF: > { %s3215_s16 = sld [smem:[#allocation10_spill]]  ;;  %s1954_s8 = sshll.u32 %s2865_s17, 4  ;;  %s1955_s8 = int_to_ptr.vmem [resolvable:$true] %s1954_s8 }
 0xd01   : > { %s3217_s28 = sld [smem:[#allocation29_spill]]  ;;  %s3218_s0 = sand.u32 1, %s2585_s30  }
 0xd02   : > { %s1942_s19 = scalar_lea.sflag [#allocation5], %s3218_s0  ;;  %s2517_s26 = scalar_lea.vmem %s1955_s8, 16 }
 0xd03   : > { %p2518_p2 = scmp.ne.s32.totalorder %s1955_s8, %s2517_s26  ;;  %s2629_s20 = smov [#allocation4]  }
 0xd04   : > { %s2521_s29 = sshll.u32 %s2629_s20, 4  ;;  %s2522_s29 = int_to_ptr.vmem [resolvable:$false] %s2521_s29 }
 0xd05   : > { %p2519_p4 = pnand %p2518_p2, %p2779_p3  ;;  %s2523_s3 = scalar_lea.vmem %s2522_s29, 32 }
 0xd06   : > { %s2204_s6 = sshll.u32 %s3215_s16, 4  ;;  %p2524_p6 = scmp.lt.s32.totalorder %s1955_s8, %s2522_s29 }
 0xd07   : > { %s1952_s2 = scalar_lea.hbm %s3217_s28, %s2204_s6  ;;  %p2520_p5 = pneg %p2519_p4 }
 0xd08   : > { %p2525_p7 = scmp.lt.s32.totalorder %s2523_s3, %s2517_s26 }
 0xd0a   : > { %p2526_p8 = por %p2525_p7, %p2524_p6 }
 0xd0c   : > { %p2527_p10 = pnand %p2526_p8, %p2520_p5 }
 0xd0e   : > { %2530 = shalt.err (!%p2527_p10)
}
 0xd0f   : > { %s2531_s27 = scalar_lea.hbm %s1952_s2, 16  ;;  %s2535_s23 = scalar_lea.hbm %s3217_s28, 32 }
 0xd10   : > { %p2532_p11 = scmp.ne.s32.totalorder %s1952_s2, %s2531_s27  ;;  %p2536_p0 = scmp.lt.s32.totalorder %s1952_s2, %s3217_s28 }
 0xd11   : > { %p2537_p1 = scmp.lt.s32.totalorder %s2535_s23, %s2531_s27 }
 0xd12   : > { %p2533_p12 = pnand %p2532_p11, %p2779_p3 }
 0xd13   : > { %p2538_p2 = por %p2537_p1, %p2536_p0 }
 0xd14   : > { %p2534_p13 = pneg %p2533_p12 }
 0xd16   : > { %p2539_p4 = pnand %p2538_p2, %p2534_p13 }
 0xd18   : > { %2542 = shalt.err (!%p2539_p4)
}
 0xd19   : > { %2361 = dma.vmem_to_hbm [thread:$0]  (%p2779_p3), %s1955_s8, 16, %s1952_s2, %s1942_s19  }
 0xd1a PF: > { %s3219_s6 = sld [smem:[#allocation13_spill]] }
 0xd1b   : > { %s3220_s1 = sld [smem:[#allocation7_spill]] }
 0xd20   : > { %p2367_p5 = scmp.ge.s32.totalorder %s3219_s6, 2 }
 0xd21   : > { %s1966_s0 = sand.u32 1, %s3220_s1  }
 0xd22   : > { %p2364_p6 = pnand %p2367_p5, %p2789_p9  ;;  %s1967_s26 = scalar_lea.sflag [#allocation5], %s1966_s0 }
 0xd24   : > { %p2365_p7 = pneg %p2364_p6 }
 0xd26   : > { %2576 = dma.done.wait (%p2365_p7), %s1967_s26, 16  }
 0xd27   : > { %2578 = vsyncadd (%p2365_p7), %s1967_s26, 4294967280  ;;  %s32_s23 = sadd.s32 1, %s3219_s6   ;;  %s3222_s20 = sld [smem:[#allocation8_spill]] }
 0xd28   : > { %p29_p8 = scmp.ge.s32.totalorder %s32_s23, 6   ;;  %s3223_s29 = sld [smem:[#allocation18_spill]] }
 0xd29   : > { %s3224_s21 = sld [smem:[#allocation11_spill]]  ;;  %s3228_s0 = smov %s2585_s30 }
 0xd2a   : > { %s3225_s1 = sld [smem:[#allocation12_spill]]  ;;  %31 = sbr.rel (!%p29_p8) target bundleno = 17 (0x11), region = 175 }
 0xd2b   : > { %s3226_s22 = sld [smem:[#allocation14_spill]] }
 0xd2c   : > { %s3227_s2 = sld [smem:[#allocation16_spill]] }
 0xd2d   : > { %s3229_s30 = smov %s3222_s20 }
 0xd2e   : > { %s3230_s20 = smov %s3223_s29 }
 0xd2f   :  { %1971 = vsyncpa [#allocation5], 1 }
 0xd30   :  { %1973 = vsyncpa [#allocation5 + $0x1], 1 }

</bundles_post_ra>
